<compile_context>
chip_gen: v5e
topology: v5e:2x2
jax: 0.10.0
libtpu: 0.0.40
codegen_flags: <defaults>
</compile_context>

<pallas_src>
import functools

import jax
import jax.numpy as jnp
from jax import lax
from jax.experimental import pallas as pl
from jax.experimental.pallas import tpu as pltpu

LANES = 128  # padded hidden / feature width (lane-dense)


# ---------------------------------------------------------------------------
# small helpers
# ---------------------------------------------------------------------------
def _round_up(x, m):
    return (x + m - 1) // m * m


def _pad2d(w, rows, cols, dtype):
    out = jnp.zeros((rows, cols), dtype)
    return out.at[: w.shape[0], : w.shape[1]].set(w.astype(dtype))


# ---------------------------------------------------------------------------
# shared in-kernel building blocks
# ---------------------------------------------------------------------------
def _gather_message_scatter(e_tile, x_ref, src_ref, dst_ref,
                            w0i_ref, w0j_ref, b0_ref, wr_ref, br_ref,
                            xi_ref, xj_ref, h_ref, acc_ref,
                            *, edge_tile, num_edges):
    """One edge tile: gather x_i/x_j, 10-layer edge MLP, segment-sum scatter."""
    base = e_tile * edge_tile

    # Gather node rows for this edge tile (PyG default flow source_to_target:
    # x_i = x[edge_index[1]] (target), x_j = x[edge_index[0]] (source)).
    def gather(i, carry):
        idx = base + i
        d = dst_ref[idx]
        s = src_ref[idx]
        xi_ref[pl.ds(i, 1), :] = x_ref[pl.ds(d, 1), :]
        xj_ref[pl.ds(i, 1), :] = x_ref[pl.ds(s, 1), :]
        return carry

    lax.fori_loop(0, edge_tile, gather, 0)

    # Edge MLP: Linear + 9 x (ReLU, Linear).  The concat [x_i, x_j] @ W0 is
    # computed as x_i @ W0_top + x_j @ W0_bot (no lane concat).  bf16 inputs,
    # f32 accumulation; ReLU/bias in f32 (friendly to v5e's VPU).
    h = (jnp.dot(xi_ref[...].astype(jnp.bfloat16), w0i_ref[...],
                 preferred_element_type=jnp.float32)
         + jnp.dot(xj_ref[...].astype(jnp.bfloat16), w0j_ref[...],
                   preferred_element_type=jnp.float32)
         + b0_ref[...])
    for l in range(wr_ref.shape[0]):
        h = jnp.dot(jnp.maximum(h, 0.0).astype(jnp.bfloat16), wr_ref[l],
                    preferred_element_type=jnp.float32) + br_ref[l]
    h_ref[...] = h

    # Segment-sum (torch_scatter reduce='sum' over edge_index[0]) into the
    # resident [N, 128] f32 accumulator.  Padded edges are masked out.
    def scatter(i, carry):
        idx = base + i
        s = src_ref[idx]
        valid = (idx < num_edges).astype(jnp.float32)
        row = h_ref[pl.ds(i, 1), :] * valid
        acc_ref[pl.ds(s, 1), :] = acc_ref[pl.ds(s, 1), :] + row
        return carry

    lax.fori_loop(0, edge_tile, scatter, 0)


def _node_decode(acc, wd1_ref, bd1_ref, wd2_ref, bd2_ref):
    """Node decoder: Linear -> ReLU -> Linear (bf16 matmuls, f32 accumulate)."""
    d = jnp.maximum(
        jnp.dot(acc.astype(jnp.bfloat16), wd1_ref[...],
                preferred_element_type=jnp.float32) + bd1_ref[...], 0.0)
    return jnp.dot(d.astype(jnp.bfloat16), wd2_ref[...],
                   preferred_element_type=jnp.float32) + bd2_ref[...]


# ---------------------------------------------------------------------------
# Kernel 1: mesh descriptor (single MGN forward, no node encoder)
# ---------------------------------------------------------------------------
def _mesh_mgn_kernel(src_ref, dst_ref,
                     x_ref, w0i_ref, w0j_ref, b0_ref, wr_ref, br_ref,
                     wd1_ref, bd1_ref, wd2_ref, bd2_ref,
                     nodes_ref,
                     xi_ref, xj_ref, h_ref, acc_ref,
                     *, edge_tile, num_edges):
    e = pl.program_id(0)

    @pl.when(e == 0)
    def _():
        acc_ref[...] = jnp.zeros_like(acc_ref)

    _gather_message_scatter(e, x_ref, src_ref, dst_ref,
                            w0i_ref, w0j_ref, b0_ref, wr_ref, br_ref,
                            xi_ref, xj_ref, h_ref, acc_ref,
                            edge_tile=edge_tile, num_edges=num_edges)

    @pl.when(e == pl.num_programs(0) - 1)
    def _():
        nodes_ref[...] = _node_decode(acc_ref[...], wd1_ref, bd1_ref,
                                      wd2_ref, bd2_ref)


def mesh_descriptor_forward(x_pad, src, dst, p, *, num_nodes_pad, num_edges,
                            edge_tile):
    n_e_tiles = src.shape[0] // edge_tile
    kern = functools.partial(_mesh_mgn_kernel, edge_tile=edge_tile,
                             num_edges=num_edges)

    def resident(shape):
        return pl.BlockSpec(shape, lambda e, *_: (0,) * len(shape))

    return pl.pallas_call(
        kern,
        out_shape=jax.ShapeDtypeStruct((num_nodes_pad, LANES), jnp.float32),
        grid_spec=pltpu.PrefetchScalarGridSpec(
            num_scalar_prefetch=2,
            grid=(n_e_tiles,),
            in_specs=[resident(x_pad.shape),
                      resident(p["w0i"].shape), resident(p["w0j"].shape),
                      resident(p["b0"].shape),
                      resident(p["wr"].shape), resident(p["br"].shape),
                      resident(p["wd1"].shape), resident(p["bd1"].shape),
                      resident(p["wd2"].shape), resident(p["bd2"].shape)],
            out_specs=resident((num_nodes_pad, LANES)),
            scratch_shapes=[pltpu.VMEM((edge_tile, LANES), jnp.float32),
                            pltpu.VMEM((edge_tile, LANES), jnp.float32),
                            pltpu.VMEM((edge_tile, LANES), jnp.float32),
                            pltpu.VMEM((num_nodes_pad, LANES), jnp.float32)]),
        compiler_params=pltpu.CompilerParams(
            dimension_semantics=("arbitrary",)),
    )(src, dst, x_pad, p["w0i"], p["w0j"], p["b0"], p["wr"], p["br"],
      p["wd1"], p["bd1"], p["wd2"], p["bd2"])


# ---------------------------------------------------------------------------
# Kernel 2: fused PARC rollout (all timesteps of the derivative solver)
# ---------------------------------------------------------------------------
def _rollout_kernel(src_ref, dst_ref,
                    mesh_h_ref, f0_ref, fb_ref,
                    wem_ref, wef_ref, wbc_ref, be_ref,
                    w0i_ref, w0j_ref, b0_ref, wr_ref, br_ref,
                    wd1_ref, bd1_ref, wd2_ref, bd2_ref,
                    fs_ref, fdot_ref,
                    mesh_enc_ref, xenc_ref, fprev_ref,
                    xi_ref, xj_ref, h_ref, acc_ref,
                    *, edge_tile, num_edges, dt):
    t = pl.program_id(0)
    e = pl.program_id(1)

    @pl.when(jnp.logical_and(t == 0, e == 0))
    def _():
        # Mesh-feature part of the encoder is constant over time: compute once.
        mesh_enc_ref[...] = jnp.dot(mesh_h_ref[...].astype(jnp.bfloat16),
                                    wem_ref[...],
                                    preferred_element_type=jnp.float32)
        fprev_ref[...] = f0_ref[...]

    @pl.when(e == 0)
    def _():
        # Split node encoder: ReLU(mesh_enc + F_prev @ W_f + bc_t * w_bc + b).
        pre = (mesh_enc_ref[...]
               + jnp.dot(fprev_ref[...].astype(jnp.bfloat16), wef_ref[...],
                         preferred_element_type=jnp.float32)
               + fb_ref[0] * wbc_ref[...]
               + be_ref[...])
        xenc_ref[...] = jnp.maximum(pre, 0.0)
        acc_ref[...] = jnp.zeros_like(acc_ref)

    _gather_message_scatter(e, xenc_ref, src_ref, dst_ref,
                            w0i_ref, w0j_ref, b0_ref, wr_ref, br_ref,
                            xi_ref, xj_ref, h_ref, acc_ref,
                            edge_tile=edge_tile, num_edges=num_edges)

    @pl.when(e == pl.num_programs(1) - 1)
    def _():
        f_dot = _node_decode(acc_ref[...], wd1_ref, bd1_ref, wd2_ref, bd2_ref)
        f_cur = fprev_ref[...] + dt * f_dot          # residual update in f32
        fdot_ref[0] = f_dot
        fs_ref[0] = f_cur
        fprev_ref[...] = f_cur                       # .detach(): value carry only


def parc_rollout(mesh_h_pad, f0_pad, fb_steps, src, dst, p,
                 *, num_nodes_pad, num_edges, edge_tile, n_steps, dt):
    n_e_tiles = src.shape[0] // edge_tile
    kern = functools.partial(_rollout_kernel, edge_tile=edge_tile,
                             num_edges=num_edges, dt=dt)

    def resident(shape):
        return pl.BlockSpec(shape, lambda t, e, *_: (0,) * len(shape))

    step_spec = pl.BlockSpec((1, num_nodes_pad, LANES),
                             lambda t, e, *_: (t, 0, 0))
    fb_spec = pl.BlockSpec((1, num_nodes_pad, 1), lambda t, e, *_: (t, 0, 0))
    out_shape = jax.ShapeDtypeStruct((n_steps, num_nodes_pad, LANES),
                                     jnp.float32)

    return pl.pallas_call(
        kern,
        out_shape=(out_shape, out_shape),
        grid_spec=pltpu.PrefetchScalarGridSpec(
            num_scalar_prefetch=2,
            grid=(n_steps, n_e_tiles),
            in_specs=[resident(mesh_h_pad.shape), resident(f0_pad.shape),
                      fb_spec,
                      resident(p["w_enc_mesh"].shape),
                      resident(p["w_enc_f"].shape),
                      resident(p["w_enc_bc"].shape),
                      resident(p["b_enc"].shape),
                      resident(p["w0i"].shape), resident(p["w0j"].shape),
                      resident(p["b0"].shape),
                      resident(p["wr"].shape), resident(p["br"].shape),
                      resident(p["wd1"].shape), resident(p["bd1"].shape),
                      resident(p["wd2"].shape), resident(p["bd2"].shape)],
            out_specs=(step_spec, step_spec),
            scratch_shapes=[
                pltpu.VMEM((num_nodes_pad, LANES), jnp.float32),  # mesh_enc
                pltpu.VMEM((num_nodes_pad, LANES), jnp.float32),  # x_enc
                pltpu.VMEM((num_nodes_pad, LANES), jnp.float32),  # F_prev
                pltpu.VMEM((edge_tile, LANES), jnp.float32),      # x_i tile
                pltpu.VMEM((edge_tile, LANES), jnp.float32),      # x_j tile
                pltpu.VMEM((edge_tile, LANES), jnp.float32),      # edge MLP out
                pltpu.VMEM((num_nodes_pad, LANES), jnp.float32),  # node accum
            ]),
        compiler_params=pltpu.CompilerParams(
            dimension_semantics=("arbitrary", "arbitrary")),
    )(src, dst, mesh_h_pad, f0_pad, fb_steps,
      p["w_enc_mesh"], p["w_enc_f"], p["w_enc_bc"], p["b_enc"],
      p["w0i"], p["w0j"], p["b0"], p["wr"], p["br"],
      p["wd1"], p["bd1"], p["wd2"], p["bd2"])


# ---------------------------------------------------------------------------
# Parameter packing (padding to 128 lanes, bf16 weights / f32 biases)
# ---------------------------------------------------------------------------
def pack_mgn_common(raw, enc_out):
    bf = jnp.bfloat16
    p = {}
    p["w0i"] = _pad2d(raw["w0"][:enc_out], LANES, LANES, bf)
    p["w0j"] = _pad2d(raw["w0"][enc_out:], LANES, LANES, bf)
    p["b0"] = _pad2d(raw["b0"], 1, LANES, jnp.float32)
    p["wr"] = jnp.stack([_pad2d(w, LANES, LANES, bf) for w in raw["wr"]])
    p["br"] = jnp.stack([_pad2d(b, 1, LANES, jnp.float32) for b in raw["br"]])
    p["wd1"] = _pad2d(raw["wd1"], LANES, LANES, bf)
    p["bd1"] = _pad2d(raw["bd1"], 1, LANES, jnp.float32)
    p["wd2"] = _pad2d(raw["wd2"], LANES, LANES, bf)
    p["bd2"] = _pad2d(raw["bd2"], 1, LANES, jnp.float32)
    return p


def pack_deriv_encoder(raw, n_hiddenfields, n_fields, n_bcfields):
    bf = jnp.bfloat16
    we = raw["we"]   # rows: [mesh_h | F_prev | bc]
    p = {}
    p["w_enc_mesh"] = _pad2d(we[:n_hiddenfields], LANES, LANES, bf)
    p["w_enc_f"] = _pad2d(we[n_hiddenfields:n_hiddenfields + n_fields],
                          LANES, LANES, bf)
    if n_bcfields > 0:
        wbc = we[n_hiddenfields + n_fields:n_hiddenfields + n_fields + 1]
        wbc = wbc.astype(bf).astype(jnp.float32)
    else:
        wbc = jnp.zeros((1, we.shape[1]), jnp.float32)
    p["w_enc_bc"] = _pad2d(wbc, 1, LANES, jnp.float32)
    p["b_enc"] = _pad2d(raw["be"], 1, LANES, jnp.float32)
    return p


# ---------------------------------------------------------------------------
# PARC_reducedV4 forward (Pallas path)
# ---------------------------------------------------------------------------
def parc_forward_pallas(F_initial, mesh_features, edge_index, F_boundary, dt,
                        mesh_raw, deriv_raw, n_timesteps, n_bcfields,
                        n_fields, n_hiddenfields, edge_tile=256):
    N = F_initial.shape[0]
    E = edge_index.shape[1]
    N_pad = _round_up(N, 8)
    edge_tile = min(edge_tile, _round_up(E, 8))
    E_pad = _round_up(E, edge_tile)

    src = jnp.zeros((E_pad,), jnp.int32).at[:E].set(edge_index[0].astype(jnp.int32))
    dst = jnp.zeros((E_pad,), jnp.int32).at[:E].set(edge_index[1].astype(jnp.int32))

    n_meshfields = mesh_features.shape[1]
    mesh_p = pack_mgn_common(mesh_raw, enc_out=n_meshfields)
    deriv_p = pack_mgn_common(deriv_raw, enc_out=2 * n_hiddenfields)
    deriv_p.update(pack_deriv_encoder(deriv_raw, n_hiddenfields, n_fields,
                                      n_bcfields))

    # mesh descriptor (run once; edge_index structure is static across time)
    x_pad = _pad2d(mesh_features, N_pad, LANES, jnp.float32)
    mesh_h_pad = mesh_descriptor_forward(x_pad, src, dst, mesh_p,
                                         num_nodes_pad=N_pad, num_edges=E,
                                         edge_tile=edge_tile)

    # fused rollout
    f0_pad = _pad2d(F_initial, N_pad, LANES, jnp.float32)
    n_steps = n_timesteps - 1
    if n_bcfields > 0:
        fb = jnp.zeros((N_pad, n_steps), jnp.float32).at[:N].set(
            F_boundary[:, 1:n_timesteps])
        fb_steps = jnp.transpose(fb)[:, :, None]       # [n_steps, N_pad, 1]
    else:
        fb_steps = jnp.zeros((n_steps, N_pad, 1), jnp.float32)

    fs_pad, fdot_pad = parc_rollout(mesh_h_pad, f0_pad, fb_steps, src, dst,
                                    deriv_p, num_nodes_pad=N_pad, num_edges=E,
                                    edge_tile=edge_tile, n_steps=n_steps,
                                    dt=float(dt))

    Fs = jnp.transpose(fs_pad[:, :N, :n_fields], (1, 0, 2))
    F_dots = jnp.transpose(fdot_pad[:, :N, :n_fields], (1, 0, 2))
    return Fs, F_dots


# ---------------------------------------------------------------------------
# Pure-JAX reference (same bf16-rounded weights) for a sanity check
# ---------------------------------------------------------------------------
def _q(w):
    return w.astype(jnp.bfloat16).astype(jnp.float32)


def mgn_reference(x, src, dst, raw, num_nodes, use_encoder):
    if use_encoder:
        x = jnp.maximum(x @ _q(raw["we"]) + raw["be"], 0.0)
    e_in = jnp.concatenate([x[dst], x[src]], axis=1)   # [x_i, x_j]
    h = e_in @ _q(raw["w0"]) + raw["b0"]
    for w, b in zip(raw["wr"], raw["br"]):
        h = jnp.maximum(h, 0.0) @ _q(w) + b
    nodes = jax.ops.segment_sum(h, src, num_segments=num_nodes)
    d = jnp.maximum(nodes @ _q(raw["wd1"]) + raw["bd1"], 0.0)
    return d @ _q(raw["wd2"]) + raw["bd2"]


def parc_reference(F_init, mesh_x, src, dst, F_bnd, dt, mesh_raw, deriv_raw,
                   n_timesteps, n_bcfields, N):
    mesh_h = mgn_reference(mesh_x, src, dst, mesh_raw, N, use_encoder=False)
    F_prev = F_init
    Fs, Fd = [], []
    for t in range(1, n_timesteps):
        F_temp = jnp.concatenate([mesh_h, F_prev], axis=1)
        if n_bcfields > 0:
            F_temp = jnp.concatenate([F_temp, F_bnd[:, t:t + 1]], axis=1)
        F_dot = mgn_reference(F_temp, src, dst, deriv_raw, N, use_encoder=True)
        F_cur = F_prev + dt * F_dot
        Fd.append(F_dot[:, None, :])
        Fs.append(F_cur[:, None, :])
        F_prev = F_cur
    return jnp.concatenate(Fs, 1), jnp.concatenate(Fd, 1)


# ---------------------------------------------------------------------------
# Deterministic synthetic parameters
# ---------------------------------------------------------------------------
def _init_linear(key, fan_in, fan_out):
    k1, k2 = jax.random.split(key)
    w = jax.random.normal(k1, (fan_in, fan_out), jnp.float32) * jnp.sqrt(
        2.0 / fan_in)
    b = jax.random.normal(k2, (1, fan_out), jnp.float32) * 0.01
    return w, b


def init_mgn_raw(key, node_in, node_out, hidden, n_hiddens, use_encoder):
    raw = {}
    keys = jax.random.split(key, n_hiddens + 4)
    if use_encoder:
        raw["we"], raw["be"] = _init_linear(keys[0], node_in, hidden)
        enc_out = hidden
    else:
        enc_out = node_in
    raw["w0"], raw["b0"] = _init_linear(keys[1], 2 * enc_out, hidden)
    raw["wr"], raw["br"] = [], []
    for i in range(n_hiddens - 1):
        w, b = _init_linear(keys[2 + i], hidden, hidden)
        raw["wr"].append(w)
        raw["br"].append(b)
    raw["wd1"], raw["bd1"] = _init_linear(keys[n_hiddens + 1], hidden, hidden)
    raw["wd2"], raw["bd2"] = _init_linear(keys[n_hiddens + 2], hidden, node_out)
    return raw


# ---------------------------------------------------------------------------
if __name__ == "__main__":
    n_fields, n_timesteps, n_hiddenfields, n_meshfields, n_bcfields = 3, 4, 16, 4, 1
    hidden = 2 * n_hiddenfields      # 32
    N, E = 16, 32
    dt = 0.1

    key = jax.random.PRNGKey(0)
    k1, k2, k3, k4, k5, k6 = jax.random.split(key, 6)

    F_initial = jax.random.normal(k1, (N, n_fields), jnp.float32)
    mesh_features = jax.random.normal(k2, (N, n_meshfields), jnp.float32)
    F_boundary = jax.random.normal(k3, (N, n_timesteps), jnp.float32)

    # edges: a ring (every node appears as a source) plus random extra edges
    ring_src = jnp.arange(N, dtype=jnp.int32)
    ring_dst = (ring_src + 1) % N
    extra_src = jax.random.randint(k4, (E - N,), 0, N, dtype=jnp.int32)
    extra_dst = jax.random.randint(k5, (E - N,), 0, N, dtype=jnp.int32)
    edge_index = jnp.stack([jnp.concatenate([ring_src, extra_src]),
                            jnp.concatenate([ring_dst, extra_dst])])

    mesh_raw = init_mgn_raw(jax.random.fold_in(k6, 0), node_in=n_meshfields,
                            node_out=n_hiddenfields, hidden=hidden,
                            n_hiddens=10, use_encoder=False)
    deriv_raw = init_mgn_raw(jax.random.fold_in(k6, 1),
                             node_in=n_fields + n_hiddenfields + n_bcfields,
                             node_out=n_fields, hidden=hidden,
                             n_hiddens=10, use_encoder=True)

    Fs, F_dots = parc_forward_pallas(F_initial, mesh_features, edge_index,
                                     F_boundary, dt, mesh_raw, deriv_raw,
                                     n_timesteps, n_bcfields, n_fields,
                                     n_hiddenfields)
    jax.block_until_ready((Fs, F_dots))

    assert Fs.shape == (N, n_timesteps - 1, n_fields)
    assert F_dots.shape == (N, n_timesteps - 1, n_fields)
    assert bool(jnp.all(jnp.isfinite(Fs))) and bool(jnp.all(jnp.isfinite(F_dots)))

    # sanity check against a pure-JAX reference using the same bf16-rounded
    # weights (loose tolerance accounts for bf16 activation rounding).
    Fs_ref, Fd_ref = parc_reference(F_initial, mesh_features, edge_index[0],
                                    edge_index[1], F_boundary, dt, mesh_raw,
                                    deriv_raw, n_timesteps, n_bcfields, N)
    rel = lambda a, b: float(jnp.linalg.norm(a - b) /
                             (jnp.linalg.norm(b) + 1e-6))
    assert rel(Fs, Fs_ref) < 0.1, ("Fs mismatch", rel(Fs, Fs_ref))
    assert rel(F_dots, Fd_ref) < 0.1, ("F_dots mismatch", rel(F_dots, Fd_ref))

    print("KERNEL_OK")
</pallas_src>

<mosaic_0001>
module attributes {stable_mosaic.version = 11 : i64} {
  func.func @_mesh_mgn_kernel(%arg0: i32, %arg1: memref<32xi32, #tpu.memory_space<smem>>, %arg2: memref<32xi32, #tpu.memory_space<smem>>, %arg3: memref<16x128xf32, #tpu.memory_space<vmem>>, %arg4: memref<128x128xbf16, #tpu.memory_space<vmem>>, %arg5: memref<128x128xbf16, #tpu.memory_space<vmem>>, %arg6: memref<1x128xf32, #tpu.memory_space<vmem>>, %arg7: memref<9x128x128xbf16, #tpu.memory_space<vmem>>, %arg8: memref<9x1x128xf32, #tpu.memory_space<vmem>>, %arg9: memref<128x128xbf16, #tpu.memory_space<vmem>>, %arg10: memref<1x128xf32, #tpu.memory_space<vmem>>, %arg11: memref<128x128xbf16, #tpu.memory_space<vmem>>, %arg12: memref<1x128xf32, #tpu.memory_space<vmem>>, %arg13: memref<16x128xf32, #tpu.memory_space<vmem>>, %arg14: memref<32x128xf32, #tpu.memory_space<vmem>>, %arg15: memref<32x128xf32, #tpu.memory_space<vmem>>, %arg16: memref<32x128xf32, #tpu.memory_space<vmem>>, %arg17: memref<16x128xf32, #tpu.memory_space<vmem>>) attributes {dimension_semantics = [#tpu.dimension_semantics<arbitrary>], iteration_bounds = array<i64: 1>, scalar_prefetch = 2 : i64, scratch_operands = 4 : i64, tpu.core_type = #tpu.core_type<tc>, window_params = [{pipeline_mode = #tpu.pipeline_mode<synchronous>, transform_indices = @transform_0, window_bounds = array<i64: 16, 128>}, {pipeline_mode = #tpu.pipeline_mode<synchronous>, transform_indices = @transform_1, window_bounds = array<i64: 128, 128>}, {pipeline_mode = #tpu.pipeline_mode<synchronous>, transform_indices = @transform_2, window_bounds = array<i64: 128, 128>}, {pipeline_mode = #tpu.pipeline_mode<synchronous>, transform_indices = @transform_3, window_bounds = array<i64: 1, 128>}, {pipeline_mode = #tpu.pipeline_mode<synchronous>, transform_indices = @transform_4, window_bounds = array<i64: 9, 128, 128>}, {pipeline_mode = #tpu.pipeline_mode<synchronous>, transform_indices = @transform_5, window_bounds = array<i64: 9, 1, 128>}, {pipeline_mode = #tpu.pipeline_mode<synchronous>, transform_indices = @transform_6, window_bounds = array<i64: 128, 128>}, {pipeline_mode = #tpu.pipeline_mode<synchronous>, transform_indices = @transform_7, window_bounds = array<i64: 1, 128>}, {pipeline_mode = #tpu.pipeline_mode<synchronous>, transform_indices = @transform_8, window_bounds = array<i64: 128, 128>}, {pipeline_mode = #tpu.pipeline_mode<synchronous>, transform_indices = @transform_9, window_bounds = array<i64: 1, 128>}, {pipeline_mode = #tpu.pipeline_mode<synchronous>, transform_indices = @transform_10, window_bounds = array<i64: 16, 128>}]} {
    %c0_i32 = arith.constant 0 : i32
    %0 = arith.cmpi eq, %arg0, %c0_i32 : i32
    %1 = arith.extui %0 : i1 to i32
    %c0_i32_0 = arith.constant 0 : i32
    %2 = arith.cmpi ne, %1, %c0_i32_0 : i32
    scf.if %2 {
      %cst_86 = arith.constant 0.000000e+00 : f32
      %112 = vector.broadcast %cst_86 : f32 to vector<16x128xf32>
      %c0_87 = arith.constant 0 : index
      %c0_88 = arith.constant 0 : index
      %113 = vector.load %arg17[%c0_87, %c0_88] : memref<16x128xf32, #tpu.memory_space<vmem>>, vector<16x128xf32>
      tpu.vector_store %arg17[%c0_87, %c0_88], %112 {strides = array<i32>} : memref<16x128xf32, #tpu.memory_space<vmem>>, vector<16x128xf32>,
    } else {
    }
    %c32_i32 = arith.constant 32 : i32
    %3 = arith.muli %arg0, %c32_i32 : i32
    %c0_i32_1 = arith.constant 0 : i32
    %c32_i32_2 = arith.constant 32 : i32
    %4 = arith.addi %c0_i32_1, %c32_i32_2 : i32
    %c1_i32 = arith.constant 1 : i32
    scf.for %arg18 = %c0_i32_1 to %4 step %c1_i32  : i32 {
      %112 = arith.addi %3, %arg18 : i32
      %113 = arith.index_cast %112 : i32 to index
      %114 = memref.load %arg2[%113] : memref<32xi32, #tpu.memory_space<smem>>
      %115 = arith.index_cast %112 : i32 to index
      %116 = memref.load %arg1[%115] : memref<32xi32, #tpu.memory_space<smem>>
      %117 = arith.index_cast %114 : i32 to index
      %c0_86 = arith.constant 0 : index
      %118 = vector.load %arg3[%117, %c0_86] : memref<16x128xf32, #tpu.memory_space<vmem>>, vector<1x128xf32>
      %119 = arith.index_cast %arg18 : i32 to index
      %c0_87 = arith.constant 0 : index
      %120 = vector.load %arg14[%119, %c0_87] : memref<32x128xf32, #tpu.memory_space<vmem>>, vector<1x128xf32>
      tpu.vector_store %arg14[%119, %c0_87], %118 {strides = array<i32>} : memref<32x128xf32, #tpu.memory_space<vmem>>, vector<1x128xf32>,
      %121 = arith.index_cast %116 : i32 to index
      %c0_88 = arith.constant 0 : index
      %122 = vector.load %arg3[%121, %c0_88] : memref<16x128xf32, #tpu.memory_space<vmem>>, vector<1x128xf32>
      %123 = arith.index_cast %arg18 : i32 to index
      %c0_89 = arith.constant 0 : index
      %124 = vector.load %arg15[%123, %c0_89] : memref<32x128xf32, #tpu.memory_space<vmem>>, vector<1x128xf32>
      tpu.vector_store %arg15[%123, %c0_89], %122 {strides = array<i32>} : memref<32x128xf32, #tpu.memory_space<vmem>>, vector<1x128xf32>,
    }
    %c32_i32_3 = arith.constant 32 : i32
    %c0 = arith.constant 0 : index
    %c0_4 = arith.constant 0 : index
    %5 = vector.load %arg14[%c0, %c0_4] : memref<32x128xf32, #tpu.memory_space<vmem>>, vector<32x128xf32>
    %6 = arith.truncf %5 : vector<32x128xf32> to vector<32x128xbf16>
    %c0_5 = arith.constant 0 : index
    %c0_6 = arith.constant 0 : index
    %7 = vector.load %arg4[%c0_5, %c0_6] : memref<128x128xbf16, #tpu.memory_space<vmem>>, vector<128x128xbf16>
    %cst = arith.constant dense<0.000000e+00> : vector<32x128xf32>
    %8 = tpu.matmul %6, %7, %cst {dimension_numbers = #tpu.dot_dimension_numbers<[1], [0], [0], [1], [0, 0, 1, 1], [], []>} : vector<32x128xbf16>, vector<128x128xbf16>, vector<32x128xf32> -> vector<32x128xf32>
    %c0_7 = arith.constant 0 : index
    %c0_8 = arith.constant 0 : index
    %9 = vector.load %arg15[%c0_7, %c0_8] : memref<32x128xf32, #tpu.memory_space<vmem>>, vector<32x128xf32>
    %10 = arith.truncf %9 : vector<32x128xf32> to vector<32x128xbf16>
    %c0_9 = arith.constant 0 : index
    %c0_10 = arith.constant 0 : index
    %11 = vector.load %arg5[%c0_9, %c0_10] : memref<128x128xbf16, #tpu.memory_space<vmem>>, vector<128x128xbf16>
    %cst_11 = arith.constant dense<0.000000e+00> : vector<32x128xf32>
    %12 = tpu.matmul %10, %11, %cst_11 {dimension_numbers = #tpu.dot_dimension_numbers<[1], [0], [0], [1], [0, 0, 1, 1], [], []>} : vector<32x128xbf16>, vector<128x128xbf16>, vector<32x128xf32> -> vector<32x128xf32>
    %13 = arith.addf %8, %12 : vector<32x128xf32>
    %c0_12 = arith.constant 0 : index
    %c0_13 = arith.constant 0 : index
    %14 = vector.load %arg6[%c0_12, %c0_13] : memref<1x128xf32, #tpu.memory_space<vmem>>, vector<1x128xf32>
    %15 = vector.broadcast %14 : vector<1x128xf32> to vector<32x128xf32>
    %16 = arith.addf %13, %15 : vector<32x128xf32>
    %cst_14 = arith.constant 0.000000e+00 : f32
    %17 = vector.broadcast %cst_14 : f32 to vector<32x128xf32>
    %18 = arith.maximumf %16, %17 : vector<32x128xf32>
    %19 = arith.truncf %18 : vector<32x128xf32> to vector<32x128xbf16>
    %c0_15 = arith.constant 0 : index
    %c0_16 = arith.constant 0 : index
    %c0_17 = arith.constant 0 : index
    %20 = vector.load %arg7[%c0_15, %c0_16, %c0_17] : memref<9x128x128xbf16, #tpu.memory_space<vmem>>, vector<1x128x128xbf16>
    %21 = vector.shape_cast %20 : vector<1x128x128xbf16> to vector<128x128xbf16>
    %cst_18 = arith.constant dense<0.000000e+00> : vector<32x128xf32>
    %22 = tpu.matmul %19, %21, %cst_18 {dimension_numbers = #tpu.dot_dimension_numbers<[1], [0], [0], [1], [0, 0, 1, 1], [], []>} : vector<32x128xbf16>, vector<128x128xbf16>, vector<32x128xf32> -> vector<32x128xf32>
    %c0_19 = arith.constant 0 : index
    %c0_20 = arith.constant 0 : index
    %c0_21 = arith.constant 0 : index
    %23 = vector.load %arg8[%c0_19, %c0_20, %c0_21] : memref<9x1x128xf32, #tpu.memory_space<vmem>>, vector<1x1x128xf32>
    %24 = vector.shape_cast %23 : vector<1x1x128xf32> to vector<1x128xf32>
    %25 = vector.broadcast %24 : vector<1x128xf32> to vector<32x128xf32>
    %26 = arith.addf %22, %25 : vector<32x128xf32>
    %cst_22 = arith.constant 0.000000e+00 : f32
    %27 = vector.broadcast %cst_22 : f32 to vector<32x128xf32>
    %28 = arith.maximumf %26, %27 : vector<32x128xf32>
    %29 = arith.truncf %28 : vector<32x128xf32> to vector<32x128xbf16>
    %c1 = arith.constant 1 : index
    %c0_23 = arith.constant 0 : index
    %c0_24 = arith.constant 0 : index
    %30 = vector.load %arg7[%c1, %c0_23, %c0_24] : memref<9x128x128xbf16, #tpu.memory_space<vmem>>, vector<1x128x128xbf16>
    %31 = vector.shape_cast %30 : vector<1x128x128xbf16> to vector<128x128xbf16>
    %cst_25 = arith.constant dense<0.000000e+00> : vector<32x128xf32>
    %32 = tpu.matmul %29, %31, %cst_25 {dimension_numbers = #tpu.dot_dimension_numbers<[1], [0], [0], [1], [0, 0, 1, 1], [], []>} : vector<32x128xbf16>, vector<128x128xbf16>, vector<32x128xf32> -> vector<32x128xf32>
    %c1_26 = arith.constant 1 : index
    %c0_27 = arith.constant 0 : index
    %c0_28 = arith.constant 0 : index
    %33 = vector.load %arg8[%c1_26, %c0_27, %c0_28] : memref<9x1x128xf32, #tpu.memory_space<vmem>>, vector<1x1x128xf32>
    %34 = vector.shape_cast %33 : vector<1x1x128xf32> to vector<1x128xf32>
    %35 = vector.broadcast %34 : vector<1x128xf32> to vector<32x128xf32>
    %36 = arith.addf %32, %35 : vector<32x128xf32>
    %cst_29 = arith.constant 0.000000e+00 : f32
    %37 = vector.broadcast %cst_29 : f32 to vector<32x128xf32>
    %38 = arith.maximumf %36, %37 : vector<32x128xf32>
    %39 = arith.truncf %38 : vector<32x128xf32> to vector<32x128xbf16>
    %c2 = arith.constant 2 : index
    %c0_30 = arith.constant 0 : index
    %c0_31 = arith.constant 0 : index
    %40 = vector.load %arg7[%c2, %c0_30, %c0_31] : memref<9x128x128xbf16, #tpu.memory_space<vmem>>, vector<1x128x128xbf16>
    %41 = vector.shape_cast %40 : vector<1x128x128xbf16> to vector<128x128xbf16>
    %cst_32 = arith.constant dense<0.000000e+00> : vector<32x128xf32>
    %42 = tpu.matmul %39, %41, %cst_32 {dimension_numbers = #tpu.dot_dimension_numbers<[1], [0], [0], [1], [0, 0, 1, 1], [], []>} : vector<32x128xbf16>, vector<128x128xbf16>, vector<32x128xf32> -> vector<32x128xf32>
    %c2_33 = arith.constant 2 : index
    %c0_34 = arith.constant 0 : index
    %c0_35 = arith.constant 0 : index
    %43 = vector.load %arg8[%c2_33, %c0_34, %c0_35] : memref<9x1x128xf32, #tpu.memory_space<vmem>>, vector<1x1x128xf32>
    %44 = vector.shape_cast %43 : vector<1x1x128xf32> to vector<1x128xf32>
    %45 = vector.broadcast %44 : vector<1x128xf32> to vector<32x128xf32>
    %46 = arith.addf %42, %45 : vector<32x128xf32>
    %cst_36 = arith.constant 0.000000e+00 : f32
    %47 = vector.broadcast %cst_36 : f32 to vector<32x128xf32>
    %48 = arith.maximumf %46, %47 : vector<32x128xf32>
    %49 = arith.truncf %48 : vector<32x128xf32> to vector<32x128xbf16>
    %c3 = arith.constant 3 : index
    %c0_37 = arith.constant 0 : index
    %c0_38 = arith.constant 0 : index
    %50 = vector.load %arg7[%c3, %c0_37, %c0_38] : memref<9x128x128xbf16, #tpu.memory_space<vmem>>, vector<1x128x128xbf16>
    %51 = vector.shape_cast %50 : vector<1x128x128xbf16> to vector<128x128xbf16>
    %cst_39 = arith.constant dense<0.000000e+00> : vector<32x128xf32>
    %52 = tpu.matmul %49, %51, %cst_39 {dimension_numbers = #tpu.dot_dimension_numbers<[1], [0], [0], [1], [0, 0, 1, 1], [], []>} : vector<32x128xbf16>, vector<128x128xbf16>, vector<32x128xf32> -> vector<32x128xf32>
    %c3_40 = arith.constant 3 : index
    %c0_41 = arith.constant 0 : index
    %c0_42 = arith.constant 0 : index
    %53 = vector.load %arg8[%c3_40, %c0_41, %c0_42] : memref<9x1x128xf32, #tpu.memory_space<vmem>>, vector<1x1x128xf32>
    %54 = vector.shape_cast %53 : vector<1x1x128xf32> to vector<1x128xf32>
    %55 = vector.broadcast %54 : vector<1x128xf32> to vector<32x128xf32>
    %56 = arith.addf %52, %55 : vector<32x128xf32>
    %cst_43 = arith.constant 0.000000e+00 : f32
    %57 = vector.broadcast %cst_43 : f32 to vector<32x128xf32>
    %58 = arith.maximumf %56, %57 : vector<32x128xf32>
    %59 = arith.truncf %58 : vector<32x128xf32> to vector<32x128xbf16>
    %c4 = arith.constant 4 : index
    %c0_44 = arith.constant 0 : index
    %c0_45 = arith.constant 0 : index
    %60 = vector.load %arg7[%c4, %c0_44, %c0_45] : memref<9x128x128xbf16, #tpu.memory_space<vmem>>, vector<1x128x128xbf16>
    %61 = vector.shape_cast %60 : vector<1x128x128xbf16> to vector<128x128xbf16>
    %cst_46 = arith.constant dense<0.000000e+00> : vector<32x128xf32>
    %62 = tpu.matmul %59, %61, %cst_46 {dimension_numbers = #tpu.dot_dimension_numbers<[1], [0], [0], [1], [0, 0, 1, 1], [], []>} : vector<32x128xbf16>, vector<128x128xbf16>, vector<32x128xf32> -> vector<32x128xf32>
    %c4_47 = arith.constant 4 : index
    %c0_48 = arith.constant 0 : index
    %c0_49 = arith.constant 0 : index
    %63 = vector.load %arg8[%c4_47, %c0_48, %c0_49] : memref<9x1x128xf32, #tpu.memory_space<vmem>>, vector<1x1x128xf32>
    %64 = vector.shape_cast %63 : vector<1x1x128xf32> to vector<1x128xf32>
    %65 = vector.broadcast %64 : vector<1x128xf32> to vector<32x128xf32>
    %66 = arith.addf %62, %65 : vector<32x128xf32>
    %cst_50 = arith.constant 0.000000e+00 : f32
    %67 = vector.broadcast %cst_50 : f32 to vector<32x128xf32>
    %68 = arith.maximumf %66, %67 : vector<32x128xf32>
    %69 = arith.truncf %68 : vector<32x128xf32> to vector<32x128xbf16>
    %c5 = arith.constant 5 : index
    %c0_51 = arith.constant 0 : index
    %c0_52 = arith.constant 0 : index
    %70 = vector.load %arg7[%c5, %c0_51, %c0_52] : memref<9x128x128xbf16, #tpu.memory_space<vmem>>, vector<1x128x128xbf16>
    %71 = vector.shape_cast %70 : vector<1x128x128xbf16> to vector<128x128xbf16>
    %cst_53 = arith.constant dense<0.000000e+00> : vector<32x128xf32>
    %72 = tpu.matmul %69, %71, %cst_53 {dimension_numbers = #tpu.dot_dimension_numbers<[1], [0], [0], [1], [0, 0, 1, 1], [], []>} : vector<32x128xbf16>, vector<128x128xbf16>, vector<32x128xf32> -> vector<32x128xf32>
    %c5_54 = arith.constant 5 : index
    %c0_55 = arith.constant 0 : index
    %c0_56 = arith.constant 0 : index
    %73 = vector.load %arg8[%c5_54, %c0_55, %c0_56] : memref<9x1x128xf32, #tpu.memory_space<vmem>>, vector<1x1x128xf32>
    %74 = vector.shape_cast %73 : vector<1x1x128xf32> to vector<1x128xf32>
    %75 = vector.broadcast %74 : vector<1x128xf32> to vector<32x128xf32>
    %76 = arith.addf %72, %75 : vector<32x128xf32>
    %cst_57 = arith.constant 0.000000e+00 : f32
    %77 = vector.broadcast %cst_57 : f32 to vector<32x128xf32>
    %78 = arith.maximumf %76, %77 : vector<32x128xf32>
    %79 = arith.truncf %78 : vector<32x128xf32> to vector<32x128xbf16>
    %c6 = arith.constant 6 : index
    %c0_58 = arith.constant 0 : index
    %c0_59 = arith.constant 0 : index
    %80 = vector.load %arg7[%c6, %c0_58, %c0_59] : memref<9x128x128xbf16, #tpu.memory_space<vmem>>, vector<1x128x128xbf16>
    %81 = vector.shape_cast %80 : vector<1x128x128xbf16> to vector<128x128xbf16>
    %cst_60 = arith.constant dense<0.000000e+00> : vector<32x128xf32>
    %82 = tpu.matmul %79, %81, %cst_60 {dimension_numbers = #tpu.dot_dimension_numbers<[1], [0], [0], [1], [0, 0, 1, 1], [], []>} : vector<32x128xbf16>, vector<128x128xbf16>, vector<32x128xf32> -> vector<32x128xf32>
    %c6_61 = arith.constant 6 : index
    %c0_62 = arith.constant 0 : index
    %c0_63 = arith.constant 0 : index
    %83 = vector.load %arg8[%c6_61, %c0_62, %c0_63] : memref<9x1x128xf32, #tpu.memory_space<vmem>>, vector<1x1x128xf32>
    %84 = vector.shape_cast %83 : vector<1x1x128xf32> to vector<1x128xf32>
    %85 = vector.broadcast %84 : vector<1x128xf32> to vector<32x128xf32>
    %86 = arith.addf %82, %85 : vector<32x128xf32>
    %cst_64 = arith.constant 0.000000e+00 : f32
    %87 = vector.broadcast %cst_64 : f32 to vector<32x128xf32>
    %88 = arith.maximumf %86, %87 : vector<32x128xf32>
    %89 = arith.truncf %88 : vector<32x128xf32> to vector<32x128xbf16>
    %c7 = arith.constant 7 : index
    %c0_65 = arith.constant 0 : index
    %c0_66 = arith.constant 0 : index
    %90 = vector.load %arg7[%c7, %c0_65, %c0_66] : memref<9x128x128xbf16, #tpu.memory_space<vmem>>, vector<1x128x128xbf16>
    %91 = vector.shape_cast %90 : vector<1x128x128xbf16> to vector<128x128xbf16>
    %cst_67 = arith.constant dense<0.000000e+00> : vector<32x128xf32>
    %92 = tpu.matmul %89, %91, %cst_67 {dimension_numbers = #tpu.dot_dimension_numbers<[1], [0], [0], [1], [0, 0, 1, 1], [], []>} : vector<32x128xbf16>, vector<128x128xbf16>, vector<32x128xf32> -> vector<32x128xf32>
    %c7_68 = arith.constant 7 : index
    %c0_69 = arith.constant 0 : index
    %c0_70 = arith.constant 0 : index
    %93 = vector.load %arg8[%c7_68, %c0_69, %c0_70] : memref<9x1x128xf32, #tpu.memory_space<vmem>>, vector<1x1x128xf32>
    %94 = vector.shape_cast %93 : vector<1x1x128xf32> to vector<1x128xf32>
    %95 = vector.broadcast %94 : vector<1x128xf32> to vector<32x128xf32>
    %96 = arith.addf %92, %95 : vector<32x128xf32>
    %cst_71 = arith.constant 0.000000e+00 : f32
    %97 = vector.broadcast %cst_71 : f32 to vector<32x128xf32>
    %98 = arith.maximumf %96, %97 : vector<32x128xf32>
    %99 = arith.truncf %98 : vector<32x128xf32> to vector<32x128xbf16>
    %c8 = arith.constant 8 : index
    %c0_72 = arith.constant 0 : index
    %c0_73 = arith.constant 0 : index
    %100 = vector.load %arg7[%c8, %c0_72, %c0_73] : memref<9x128x128xbf16, #tpu.memory_space<vmem>>, vector<1x128x128xbf16>
    %101 = vector.shape_cast %100 : vector<1x128x128xbf16> to vector<128x128xbf16>
    %cst_74 = arith.constant dense<0.000000e+00> : vector<32x128xf32>
    %102 = tpu.matmul %99, %101, %cst_74 {dimension_numbers = #tpu.dot_dimension_numbers<[1], [0], [0], [1], [0, 0, 1, 1], [], []>} : vector<32x128xbf16>, vector<128x128xbf16>, vector<32x128xf32> -> vector<32x128xf32>
    %c8_75 = arith.constant 8 : index
    %c0_76 = arith.constant 0 : index
    %c0_77 = arith.constant 0 : index
    %103 = vector.load %arg8[%c8_75, %c0_76, %c0_77] : memref<9x1x128xf32, #tpu.memory_space<vmem>>, vector<1x1x128xf32>
    %104 = vector.shape_cast %103 : vector<1x1x128xf32> to vector<1x128xf32>
    %105 = vector.broadcast %104 : vector<1x128xf32> to vector<32x128xf32>
    %106 = arith.addf %102, %105 : vector<32x128xf32>
    %c0_78 = arith.constant 0 : index
    %c0_79 = arith.constant 0 : index
    %107 = vector.load %arg16[%c0_78, %c0_79] : memref<32x128xf32, #tpu.memory_space<vmem>>, vector<32x128xf32>
    tpu.vector_store %arg16[%c0_78, %c0_79], %106 {strides = array<i32>} : memref<32x128xf32, #tpu.memory_space<vmem>>, vector<32x128xf32>,
    %c0_i32_80 = arith.constant 0 : i32
    %c32_i32_81 = arith.constant 32 : i32
    %108 = arith.addi %c0_i32_80, %c32_i32_81 : i32
    %c1_i32_82 = arith.constant 1 : i32
    scf.for %arg18 = %c0_i32_80 to %108 step %c1_i32_82  : i32 {
      %112 = arith.addi %3, %arg18 : i32
      %113 = arith.index_cast %112 : i32 to index
      %114 = memref.load %arg1[%113] : memref<32xi32, #tpu.memory_space<smem>>
      %c32_i32_86 = arith.constant 32 : i32
      %115 = arith.cmpi slt, %112, %c32_i32_86 : i32
      %116 = arith.extui %115 : i1 to i32
      %117 = arith.sitofp %116 : i32 to f32
      %118 = arith.index_cast %arg18 : i32 to index
      %c0_87 = arith.constant 0 : index
      %119 = vector.load %arg16[%118, %c0_87] : memref<32x128xf32, #tpu.memory_space<vmem>>, vector<1x128xf32>
      %120 = vector.broadcast %117 : f32 to vector<1x128xf32>
      %121 = arith.mulf %119, %120 : vector<1x128xf32>
      %122 = arith.index_cast %114 : i32 to index
      %c0_88 = arith.constant 0 : index
      %123 = vector.load %arg17[%122, %c0_88] : memref<16x128xf32, #tpu.memory_space<vmem>>, vector<1x128xf32>
      %124 = arith.addf %123, %121 : vector<1x128xf32>
      %125 = arith.index_cast %114 : i32 to index
      %c0_89 = arith.constant 0 : index
      %126 = vector.load %arg17[%125, %c0_89] : memref<16x128xf32, #tpu.memory_space<vmem>>, vector<1x128xf32>
      tpu.vector_store %arg17[%125, %c0_89], %124 {strides = array<i32>} : memref<16x128xf32, #tpu.memory_space<vmem>>, vector<1x128xf32>,
    }
    %c32_i32_83 = arith.constant 32 : i32
    %c0_i32_84 = arith.constant 0 : i32
    %109 = arith.cmpi eq, %arg0, %c0_i32_84 : i32
    %110 = arith.extui %109 : i1 to i32
    %c0_i32_85 = arith.constant 0 : i32
    %111 = arith.cmpi ne, %110, %c0_i32_85 : i32
    scf.if %111 {
      %c0_86 = arith.constant 0 : index
      %c0_87 = arith.constant 0 : index
      %112 = vector.load %arg17[%c0_86, %c0_87] : memref<16x128xf32, #tpu.memory_space<vmem>>, vector<16x128xf32>
      %113 = arith.truncf %112 : vector<16x128xf32> to vector<16x128xbf16>
      %c0_88 = arith.constant 0 : index
      %c0_89 = arith.constant 0 : index
      %114 = vector.load %arg9[%c0_88, %c0_89] : memref<128x128xbf16, #tpu.memory_space<vmem>>, vector<128x128xbf16>
      %cst_90 = arith.constant dense<0.000000e+00> : vector<16x128xf32>
      %115 = tpu.matmul %113, %114, %cst_90 {dimension_numbers = #tpu.dot_dimension_numbers<[1], [0], [0], [1], [0, 0, 1, 1], [], []>} : vector<16x128xbf16>, vector<128x128xbf16>, vector<16x128xf32> -> vector<16x128xf32>
      %c0_91 = arith.constant 0 : index
      %c0_92 = arith.constant 0 : index
      %116 = vector.load %arg10[%c0_91, %c0_92] : memref<1x128xf32, #tpu.memory_space<vmem>>, vector<1x128xf32>
      %117 = vector.broadcast %116 : vector<1x128xf32> to vector<16x128xf32>
      %118 = arith.addf %115, %117 : vector<16x128xf32>
      %cst_93 = arith.constant 0.000000e+00 : f32
      %119 = vector.broadcast %cst_93 : f32 to vector<16x128xf32>
      %120 = arith.maximumf %118, %119 : vector<16x128xf32>
      %121 = arith.truncf %120 : vector<16x128xf32> to vector<16x128xbf16>
      %c0_94 = arith.constant 0 : index
      %c0_95 = arith.constant 0 : index
      %122 = vector.load %arg11[%c0_94, %c0_95] : memref<128x128xbf16, #tpu.memory_space<vmem>>, vector<128x128xbf16>
      %cst_96 = arith.constant dense<0.000000e+00> : vector<16x128xf32>
      %123 = tpu.matmul %121, %122, %cst_96 {dimension_numbers = #tpu.dot_dimension_numbers<[1], [0], [0], [1], [0, 0, 1, 1], [], []>} : vector<16x128xbf16>, vector<128x128xbf16>, vector<16x128xf32> -> vector<16x128xf32>
      %c0_97 = arith.constant 0 : index
      %c0_98 = arith.constant 0 : index
      %124 = vector.load %arg12[%c0_97, %c0_98] : memref<1x128xf32, #tpu.memory_space<vmem>>, vector<1x128xf32>
      %125 = vector.broadcast %124 : vector<1x128xf32> to vector<16x128xf32>
      %126 = arith.addf %123, %125 : vector<16x128xf32>
      %c0_99 = arith.constant 0 : index
      %c0_100 = arith.constant 0 : index
      %127 = vector.load %arg13[%c0_99, %c0_100] : memref<16x128xf32, #tpu.memory_space<vmem>>, vector<16x128xf32>
      tpu.vector_store %arg13[%c0_99, %c0_100], %126 {strides = array<i32>} : memref<16x128xf32, #tpu.memory_space<vmem>>, vector<16x128xf32>,
    } else {
    }
    return
  }
  func.func @transform_0(%arg0: i32, %arg1: memref<32xi32, #tpu.memory_space<smem>>, %arg2: memref<32xi32, #tpu.memory_space<smem>>) -> (i32, i32) {
    %c0_i32 = arith.constant 0 : i32
    %c0_i32_0 = arith.constant 0 : i32
    %c0_i32_1 = arith.constant 0 : i32
    return %c0_i32, %c0_i32_0 : i32, i32
  }
  func.func @transform_1(%arg0: i32, %arg1: memref<32xi32, #tpu.memory_space<smem>>, %arg2: memref<32xi32, #tpu.memory_space<smem>>) -> (i32, i32) {
    %c0_i32 = arith.constant 0 : i32
    %c0_i32_0 = arith.constant 0 : i32
    %c0_i32_1 = arith.constant 0 : i32
    return %c0_i32, %c0_i32_0 : i32, i32
  }
  func.func @transform_2(%arg0: i32, %arg1: memref<32xi32, #tpu.memory_space<smem>>, %arg2: memref<32xi32, #tpu.memory_space<smem>>) -> (i32, i32) {
    %c0_i32 = arith.constant 0 : i32
    %c0_i32_0 = arith.constant 0 : i32
    %c0_i32_1 = arith.constant 0 : i32
    return %c0_i32, %c0_i32_0 : i32, i32
  }
  func.func @transform_3(%arg0: i32, %arg1: memref<32xi32, #tpu.memory_space<smem>>, %arg2: memref<32xi32, #tpu.memory_space<smem>>) -> (i32, i32) {
    %c0_i32 = arith.constant 0 : i32
    %c0_i32_0 = arith.constant 0 : i32
    %c0_i32_1 = arith.constant 0 : i32
    return %c0_i32, %c0_i32_0 : i32, i32
  }
  func.func @transform_4(%arg0: i32, %arg1: memref<32xi32, #tpu.memory_space<smem>>, %arg2: memref<32xi32, #tpu.memory_space<smem>>) -> (i32, i32, i32) {
    %c0_i32 = arith.constant 0 : i32
    %c0_i32_0 = arith.constant 0 : i32
    %c0_i32_1 = arith.constant 0 : i32
    %c0_i32_2 = arith.constant 0 : i32
    return %c0_i32, %c0_i32_0, %c0_i32_1 : i32, i32, i32
  }
  func.func @transform_5(%arg0: i32, %arg1: memref<32xi32, #tpu.memory_space<smem>>, %arg2: memref<32xi32, #tpu.memory_space<smem>>) -> (i32, i32, i32) {
    %c0_i32 = arith.constant 0 : i32
    %c0_i32_0 = arith.constant 0 : i32
    %c0_i32_1 = arith.constant 0 : i32
    %c0_i32_2 = arith.constant 0 : i32
    return %c0_i32, %c0_i32_0, %c0_i32_1 : i32, i32, i32
  }
  func.func @transform_6(%arg0: i32, %arg1: memref<32xi32, #tpu.memory_space<smem>>, %arg2: memref<32xi32, #tpu.memory_space<smem>>) -> (i32, i32) {
    %c0_i32 = arith.constant 0 : i32
    %c0_i32_0 = arith.constant 0 : i32
    %c0_i32_1 = arith.constant 0 : i32
    return %c0_i32, %c0_i32_0 : i32, i32
  }
  func.func @transform_7(%arg0: i32, %arg1: memref<32xi32, #tpu.memory_space<smem>>, %arg2: memref<32xi32, #tpu.memory_space<smem>>) -> (i32, i32) {
    %c0_i32 = arith.constant 0 : i32
    %c0_i32_0 = arith.constant 0 : i32
    %c0_i32_1 = arith.constant 0 : i32
    return %c0_i32, %c0_i32_0 : i32, i32
  }
  func.func @transform_8(%arg0: i32, %arg1: memref<32xi32, #tpu.memory_space<smem>>, %arg2: memref<32xi32, #tpu.memory_space<smem>>) -> (i32, i32) {
    %c0_i32 = arith.constant 0 : i32
    %c0_i32_0 = arith.constant 0 : i32
    %c0_i32_1 = arith.constant 0 : i32
    return %c0_i32, %c0_i32_0 : i32, i32
  }
  func.func @transform_9(%arg0: i32, %arg1: memref<32xi32, #tpu.memory_space<smem>>, %arg2: memref<32xi32, #tpu.memory_space<smem>>) -> (i32, i32) {
    %c0_i32 = arith.constant 0 : i32
    %c0_i32_0 = arith.constant 0 : i32
    %c0_i32_1 = arith.constant 0 : i32
    return %c0_i32, %c0_i32_0 : i32, i32
  }
  func.func @transform_10(%arg0: i32, %arg1: memref<32xi32, #tpu.memory_space<smem>>, %arg2: memref<32xi32, #tpu.memory_space<smem>>) -> (i32, i32) {
    %c0_i32 = arith.constant 0 : i32
    %c0_i32_0 = arith.constant 0 : i32
    %c0_i32_1 = arith.constant 0 : i32
    return %c0_i32, %c0_i32_0 : i32, i32
  }
}

</mosaic_0001>

<bundles_post_ra>
// kernel: tpu_custom_call.1
= control target key start
LH: loop header
LB: loop body
LE: loop exit
PB: predicated region body
PF: predicated region fallthrough
CT: control target
= control target key end

     0   :  { %s2268_s27 = smov [#allocation7]   ;;  %s2269_s28 = smov [#allocation8]   ;;  %s2410_s0 = inlined_call_operand.hbm [shape: s32[32], index: 0, kind: input, shape index: {}]   ;;  %s2411_s2 = inlined_call_operand.hbm [shape: f32[16,128], index: 2, kind: input, shape index: {}]   ;;  %s2412_s3 = inlined_call_operand.hbm [shape: bf16[128,128], index: 3, kind: input, shape index: {}]   ;;  %s2413_s4 = inlined_call_operand.hbm [shape: bf16[128,128], index: 4, kind: input, shape index: {}]   ;;  %s2414_s5 = inlined_call_operand.vmem [shape: f32[1,128], index: 5, kind: input, shape index: {}]   ;;  %s2415_s6 = inlined_call_operand.hbm [shape: bf16[9,128,128], index: 6, kind: input, shape index: {}]   ;;  %s2416_s7 = inlined_call_operand.hbm [shape: f32[9,1,128], index: 7, kind: input, shape index: {}]   ;;  %s2417_s8 = inlined_call_operand.hbm [shape: bf16[128,128], index: 8, kind: input, shape index: {}]   ;;  %s2418_s9 = inlined_call_operand.vmem [shape: f32[1,128], index: 9, kind: input, shape index: {}]   ;;  %s2419_s10 = inlined_call_operand.hbm [shape: bf16[128,128], index: 10, kind: input, shape index: {}]   ;;  %s2420_s11 = inlined_call_operand.vmem [shape: f32[1,128], index: 11, kind: input, shape index: {}]   ;;  %s2421_s12 = inlined_call_operand.hbm [shape: f32[16,128], index: 12, kind: output, shape index: {}]   ;;  %s2422_s1 = inlined_call_operand.hbm [shape: s32[32], index: 1, kind: input, shape index: {}]  }
   0x1   :  { %s18_s23 = sshll.u32 %s2410_s0, 4  ;;  %s23_s26 = sshll.u32 %s2422_s1, 4  ;;  %s19_s23 = int_to_ptr.hbm [resolvable:$true] %s18_s23  ;;  %s24_s26 = int_to_ptr.hbm [resolvable:$true] %s23_s26 }
   0x2   :  { %21 = dma.hbm_to_smem %s19_s23, 16, %s2268_s27, [#allocation6] }
   0x3   :  { %26 = dma.hbm_to_smem %s24_s26, 16, %s2269_s28, [#allocation6] }
   0x4   :  { %2248 = dma.done.wait [#allocation6], 32 }
   0x5   :  { %2249 = vsyncadd [#allocation6], 4294967264 }
   0x6   :  { %29 = sfence }
   0x7   :  { %30 = vsyncpa [#allocation10], 0 }
   0x8   :  { %31 = vsyncpa [#allocation13], 0 }
   0x9   :  { %32 = vsyncpa [#allocation16], 0 }
   0xa   :  { %33 = vsyncpa [#allocation19], 0  ;;  %s52_s0 = sshll.u32 %s2412_s3, 4  ;;  %s53_s0 = int_to_ptr.hbm [resolvable:$true] %s52_s0 }
   0xb   :  { %34 = vsyncpa [#allocation11], 0  ;;  %s2270_s1 = smov [#allocation12]   ;;  %s80_s16 = sshll.u32 %s2415_s6, 4  ;;  %s81_s16 = int_to_ptr.hbm [resolvable:$true] %s80_s16 }
   0xc   :  { %s54_s13 = sshll.u32 %s2270_s1, 4  ;;  %s2271_s17 = smov 64   ;;  %s55_s13 = int_to_ptr.vmem [resolvable:$true] %s54_s13 }
   0xd   :  { %s2272_s18 = smov 4   ;;  %s2273_s19 = smov [#allocation15]  }
   0xe   :  { %60 = dma.hbm_to_vmem [thread:$0]  %s53_s0, 1024, %s55_s13, [#allocation13], %s2271_s17, %s2271_s17, %s2272_s18  }
   0xf   :  { %s82_s20 = sshll.u32 %s2273_s19, 4  ;;  %s106_s22 = sshll.u32 %s2417_s8, 4  ;;  %s83_s20 = int_to_ptr.vmem [resolvable:$true] %s82_s20  ;;  %s107_s22 = int_to_ptr.hbm [resolvable:$true] %s106_s22 }
  0x10   :  { %88 = dma.hbm_to_vmem [thread:$0]  %s81_s16, 9216, %s83_s20, [#allocation16], %s2271_s17, %s2271_s17, %s2272_s18  }
  0x11   :  { %s39_s24 = sshll.u32 %s2411_s2, 4  ;;  %s2274_s25 = smov [#allocation18]   ;;  %s40_s24 = int_to_ptr.hbm [resolvable:$true] %s39_s24 }
  0x12   :  { %s108_s26 = sshll.u32 %s2274_s25, 4  ;;  %s2275_s27 = smov [#allocation9]   ;;  %s109_s26 = int_to_ptr.vmem [resolvable:$true] %s108_s26 }
  0x13   :  { %114 = dma.hbm_to_vmem [thread:$0]  %s107_s22, 1024, %s109_s26, [#allocation19], %s2271_s17, %s2271_s17, %s2272_s18  }
  0x14   :  { %s41_s8 = sshll.u32 %s2275_s27, 4  ;;  %s2276_s28 = smov 128   ;;  %s42_s8 = int_to_ptr.vmem [resolvable:$true] %s41_s8 }
  0x15   :  { %s2277_s29 = smov 8   ;;  %s65_s2 = sshll.u32 %s2413_s4, 4  ;;  %s66_s2 = int_to_ptr.hbm [resolvable:$true] %s65_s2 }
  0x16   :  { %47 = dma.hbm_to_vmem [thread:$0]  %s40_s24, 256, %s42_s8, [#allocation10], %s2276_s28, %s2276_s28, %s2277_s29  }
  0x17   :  { %s2278_s1 = smov [#allocation14]   ;;  %s93_s16 = sshll.u32 %s2416_s7, 4  ;;  %s94_s16 = int_to_ptr.hbm [resolvable:$true] %s93_s16 }
  0x18   :  { %s67_s13 = sshll.u32 %s2278_s1, 4  ;;  %s2279_s19 = smov [#allocation17]   ;;  %s68_s13 = int_to_ptr.vmem [resolvable:$true] %s67_s13 }
  0x19   :  { %73 = dma.hbm_to_vmem [thread:$0]  %s66_s2, 1024, %s68_s13, [#allocation13], %s2271_s17, %s2271_s17, %s2272_s18  }
  0x1a   :  { %s95_s20 = sshll.u32 %s2279_s19, 4  ;;  %s2280_s21 = smov 16   ;;  %s96_s20 = int_to_ptr.vmem [resolvable:$true] %s95_s20 }
  0x1b   :  { %s2281_s3 = smov 1   ;;  %s121_s6 = sshll.u32 %s2419_s10, 4  ;;  %s122_s6 = int_to_ptr.hbm [resolvable:$true] %s121_s6 }
  0x1c   :  { %101 = dma.hbm_to_vmem [thread:$0]  %s94_s16, 144, %s96_s20, [#allocation16], %s2280_s21, %s2280_s21, %s2281_s3  }
  0x1d   :  { %s2282_s23 = smov [#allocation20]  }
  0x1e   :  { %s123_s24 = sshll.u32 %s2282_s23, 4  ;;  %s124_s24 = int_to_ptr.vmem [resolvable:$true] %s123_s24 }
  0x1f   :  { %129 = dma.hbm_to_vmem [thread:$0]  %s122_s6, 1024, %s124_s24, [#allocation19], %s2271_s17, %s2271_s17, %s2272_s18  }
  0x20   :  { %2250 = dma.done.wait [#allocation10], 256  }
  0x21   :  { %2251 = vsyncadd [#allocation10], 4294967040 }
  0x22   :  { %2252 = dma.done.wait [#allocation13], 2048  }
  0x23   :  { %2253 = vsyncadd [#allocation13], 4294965248 }
  0x24   :  { %2254 = dma.done.wait [#allocation16], 9360  }
  0x25   :  { %2255 = vsyncadd [#allocation16], 4294957936 }
  0x26   :  { %2256 = dma.done.wait [#allocation19], 2048  }
  0x27   :  { %2257 = vsyncadd [#allocation19], 4294965248  ;;  %v2283_v0 = vmov 0.0   ;;  %s2260_s7 = smov 0  }
  0x28   :  { %164 = vst [vmem:[#allocation5] sm:$0xff] %v2283_v0 }
  0x29   :  { %165 = vst [vmem:[#allocation5 + $0x8] sm:$0xff] %v2283_v0 }
  0x2a LB: > { %s174_s10 = sld [smem:[#allocation8 + %s2262_s7]]  ;;  %s178_s17 = scalar_lea.vmem [#allocation2], %s2262_s7  ;;  %s2262_s7 = sphi %s2260_s7, %s172_s7  }
  0x2b   : > { %s175_s25 = sld [smem:[#allocation7 + %s2262_s7]]  ;;  %s182_s27 = scalar_lea.vmem [#allocation3], %s2262_s7 }
  0x2c   : > { %s172_s7 = sadd.s32 1, %s2262_s7  }
  0x2d   : > { %p169_p0 = scmp.ge.s32.totalorder %s172_s7, 32  }
  0x2e   :  { %v1890_v3 = vld [vmem:[#allocation14 + $0x38] sm:$0xff] (%p169_p0)  ;;  %v1889_v5 = vld [vmem:[#allocation14 + $0x30] sm:$0xff] (%p169_p0)  ;;  %v1888_v7 = vld [vmem:[#allocation14 + $0x28] sm:$0xff] (%p169_p0) }
  0x2f   :  { %171 = sbr.rel (!%p169_p0) target bundleno = 42 (0x2a), region = 132  ;;  %v1882_v4 = vld [vmem:[#allocation12 + $0x38] sm:$0xff] (%p169_p0)  ;;  %276 = vmatpush.bf16.msra.mxu0 (%p169_p0), %v1890_v3  ;;  %v1881_v6 = vld [vmem:[#allocation12 + $0x30] sm:$0xff] (%p169_p0)  ;;  %v1880_v8 = vld [vmem:[#allocation12 + $0x28] sm:$0xff] (%p169_p0) }
  0x30   : > { %s176_s26 = scalar_lea.vmem [#allocation9], %s174_s10  ;;  %343 = vmatpush.bf16.msra.mxu1 (%p169_p0), %v1882_v4  ;;  %v1887_v9 = vld [vmem:[#allocation14 + $0x20] sm:$0xff] (%p169_p0)  ;;  %v1886_v11 = vld [vmem:[#allocation14 + $0x18] sm:$0xff] (%p169_p0)  ;;  %v1885_v14 = vld [vmem:[#allocation14 + $0x10] sm:$0xff] (%p169_p0) }
  0x31   : > { %v177_v1 = vld [vmem:[%s176_s26] sm:$0x1]  ;;  %s180_s18 = scalar_lea.vmem [#allocation9], %s175_s25  ;;  %v1878_v12 = vld [vmem:[#allocation12 + $0x18] sm:$0xff] (%p169_p0)  ;;  %v1877_v15 = vld [vmem:[#allocation12 + $0x10] sm:$0xff] (%p169_p0) }
  0x32   : > { %179 = vst [vmem:[%s178_s17] sm:$0x1] %v177_v1  ;;  %v181_v2 = vld [vmem:[%s180_s18] sm:$0x1]  ;;  %v1898_v13 = vld [vmem:[#allocation15 + $0x38] sm:$0xff] (%p169_p0)  ;;  %v1897_v16 = vld [vmem:[#allocation15 + $0x30] sm:$0xff] (%p169_p0) }
  0x33   : > { %183 = vst [vmem:[%s182_s27] sm:$0x1] %v181_v2  ;;  %277 = vmatpush.bf16.msra.mxu0 (%p169_p0), %v1889_v5  ;;  %v1879_v10 = vld [vmem:[#allocation12 + $0x20] sm:$0xff] (%p169_p0)  ;;  %444 = vmatpush.bf16.msra.mxu2 (%p169_p0), %v1898_v13  ;;  %v1884_v17 = vld [vmem:[#allocation14 + $0x8] sm:$0xff] (%p169_p0)  ;;  %v1894_v35 = vld [vmem:[#allocation15 + $0x18] sm:$0xff] (%p169_p0) }
  0x34   :  { %344 = vmatpush.bf16.msra.mxu1 %v1881_v6  ;;  %v1876_v18 = vld [vmem:[#allocation12 + $0x8] sm:$0xff]  ;;  %v1883_v20 = vld [vmem:[#allocation14] sm:$0xff]  ;;  %v1893_v36 = vld [vmem:[#allocation15 + $0x10] sm:$0xff] }
  0x35   :  { %v1896_v19 = vld [vmem:[#allocation15 + $0x28] sm:$0xff]  ;;  %v1875_v21 = vld [vmem:[#allocation12] sm:$0xff]  ;;  %v1906_v41 = vld [vmem:[#allocation15 + $0x78] sm:$0xff] }
  0x36   :  { %v1895_v26 = vld [vmem:[#allocation15 + $0x20] sm:$0xff]  ;;  %v1892_v37 = vld [vmem:[#allocation15 + $0x8] sm:$0xff]  ;;  %539 = vmatpush.bf16.msra.mxu3 %v1906_v41  ;;  %v1905_v42 = vld [vmem:[#allocation15 + $0x70] sm:$0xff] }
  0x37   :  { %278 = vmatpush.bf16.msra.mxu0 %v1888_v7  ;;  %445 = vmatpush.bf16.msra.mxu2 %v1897_v16  ;;  %v1891_v38 = vld [vmem:[#allocation15] sm:$0xff]  ;;  %v1904_v45 = vld [vmem:[#allocation15 + $0x68] sm:$0xff]  ;;  %v1902_v2 = vld [vmem:[#allocation15 + $0x58] sm:$0xff] }
  0x38   :  { %345 = vmatpush.bf16.msra.mxu1 %v1880_v8  ;;  %v2012_v44 = vld [vmem:[%s2414_s5] ss:$0 sm:$0xff]  ;;  %v1901_v3 = vld [vmem:[#allocation15 + $0x50] sm:$0xff]  ;;  %v1900_v4 = vld [vmem:[#allocation15 + $0x48] sm:$0xff]  ;;  %s2264_s5 = smov 0  }
  0x39   :  { %v184_v24 = vld [vmem:[#allocation2] sm:$0xff]  ;;  %v185_v25 = vld [vmem:[#allocation2 + $0x8] sm:$0xff]  ;;  %v186_v31 = vld [vmem:[#allocation2 + $0x10] sm:$0xff] }
  0x3a   :  { %v206_v22 = vld [vmem:[#allocation3] sm:$0xff]  ;;  %v207_v23 = vld [vmem:[#allocation3 + $0x8] sm:$0xff]  ;;  %v188_v28 = vpack.c.bf16 %v185_v25, %v184_v24  ;;  %v208_v29 = vld [vmem:[#allocation3 + $0x10] sm:$0xff]  ;;  %540 = vmatpush.bf16.msra.mxu3 %v1905_v42 }
  0x3b   :  { %279 = vmatpush.bf16.msra.mxu0 %v1887_v9  ;;  %446 = vmatpush.bf16.msra.mxu2 %v1896_v19  ;;  %v210_v27 = vpack.c.bf16 %v207_v23, %v206_v22  ;;  %v209_v30 = vld [vmem:[#allocation3 + $0x18] sm:$0xff]  ;;  %v1903_v51 = vld [vmem:[#allocation15 + $0x60] sm:$0xff]  ;;  %v1913_v8 = vld [vmem:[#allocation15 + $0xb0] sm:$0xff] }
  0x3c   :  { %346 = vmatpush.bf16.msra.mxu1 %v1879_v10  ;;  %v187_v32 = vld [vmem:[#allocation2 + $0x18] sm:$0xff]  ;;  %v211_v33 = vpack.c.bf16 %v209_v30, %v208_v29  ;;  %v1899_v5 = vld [vmem:[#allocation15 + $0x40] sm:$0xff]  ;;  %v1912_v10 = vld [vmem:[#allocation15 + $0xa8] sm:$0xff] }
  0x3d   :  { %v189_v34 = vpack.c.bf16 %v187_v32, %v186_v31  ;;  %v1914_v6 = vld [vmem:[#allocation15 + $0xb8] sm:$0xff]  ;;  %v2013_v9 = vld [vmem:[#allocation17] ss:$0 sm:$0xff]  ;;  %v1921_v31 = vld [vmem:[#allocation15 + $0xf0] sm:$0xff] }
  0x3e   :  { %541 = vmatpush.bf16.msra.mxu3 %v1904_v45  ;;  %v1922_v29 = vld [vmem:[#allocation15 + $0xf8] sm:$0xff]  ;;  %v2014_v32 = vld [vmem:[#allocation17 + $0x1] ss:$0 sm:$0xff] }
  0x3f   :  { %280 = vmatpush.bf16.msra.mxu0 %v1886_v11  ;;  %447 = vmatpush.bf16.msra.mxu2 %v1895_v26  ;;  %v1909_v26 = vld [vmem:[#allocation15 + $0x90] sm:$0xff]  ;;  %v1918_v41 = vld [vmem:[#allocation15 + $0xd8] sm:$0xff] }
  0x40   :  { %347 = vmatpush.bf16.msra.mxu1 %v1878_v12 }
  0x42   :  { %542 = vmatpush.bf16.msra.mxu3 %v1903_v51  ;;  %v1915_v51 = vld [vmem:[#allocation15 + $0xc0] sm:$0xff] }
  0x43   :  { %281 = vmatpush.bf16.msra.mxu0 %v1885_v14  ;;  %448 = vmatpush.bf16.msra.mxu2 %v1894_v35  ;;  %v1911_v14 = vld [vmem:[#allocation15 + $0xa0] sm:$0xff] }
  0x44   :  { %348 = vmatpush.bf16.msra.mxu1 %v1877_v15 }
  0x46   :  { %543 = vmatpush.bf16.msra.mxu3 %v1902_v2 }
  0x47   :  { %282 = vmatpush.bf16.msra.mxu0 %v1884_v17  ;;  %449 = vmatpush.bf16.msra.mxu2 %v1893_v36 }
  0x48   :  { %349 = vmatpush.bf16.msra.mxu1 %v1876_v18  ;;  %v1910_v18 = vld [vmem:[#allocation15 + $0x98] sm:$0xff] }
  0x4a   :  { %544 = vmatpush.bf16.msra.mxu3 %v1901_v3 }
  0x4b   :  { %283 = vmatpush.bf16.msra.mxu0 %v1883_v20  ;;  %450 = vmatpush.bf16.msra.mxu2 %v1892_v37  ;;  %v1919_v37 = vld [vmem:[#allocation15 + $0xe0] sm:$0xff] }
  0x4c   :  { %350 = vmatpush.bf16.msra.mxu1 %v1875_v21 }
  0x4e   :  { %284 = vmatmul.bf16.vlgmr.msra.gmra.mxu0 %v210_v27  ;;  %545 = vmatpush.bf16.msra.mxu3 %v1900_v4  ;;  %v1908_v27 = vld [vmem:[#allocation15 + $0x88] sm:$0xff] }
  0x4f   :  { %351 = vmatmul.bf16.vlgmr.msra.gmra.mxu1 %v188_v28  ;;  %451 = vmatpush.bf16.msra.mxu2 %v1891_v38  ;;  %v1907_v28 = vld [vmem:[#allocation15 + $0x80] sm:$0xff] }
  0x50   :  { %634 = vmatpush.bf16.msrb.mxu0 %v1914_v6  ;;  %729 = vmatpush.bf16.msrb.mxu1 %v1922_v29 }
  0x52   :  { %546 = vmatpush.bf16.msra.mxu3 %v1899_v5 }
  0x54   :  { %635 = vmatpush.bf16.msrb.mxu0 %v1913_v8  ;;  %730 = vmatpush.bf16.msrb.mxu1 %v1921_v31  ;;  %v1925_v8 = vld [vmem:[#allocation15 + $0x110] sm:$0xff] }
  0x55   :  { %v1933_v31 = vld [vmem:[#allocation15 + $0x150] sm:$0xff] }
  0x58   :  { %636 = vmatpush.bf16.msrb.mxu0 %v1912_v10  ;;  %v1923_v10 = vld [vmem:[#allocation15 + $0x100] sm:$0xff] }
  0x5c   :  { %637 = vmatpush.bf16.msrb.mxu0 %v1911_v14  ;;  %v2016_v14 = vld [vmem:[#allocation17 + $0x3] ss:$0 sm:$0xff] }
  0x5e   :  { %289 = vmatmul.bf16.gmra.mxu0 %v211_v33  ;;  %v1920_v33 = vld [vmem:[#allocation15 + $0xe8] sm:$0xff] }
  0x5f   :  { %356 = vmatmul.bf16.gmra.mxu1 %v189_v34 }
  0x60   :  { %638 = vmatpush.bf16.msrb.mxu0 %v1910_v18  ;;  %731 = vmatpush.bf16.msrb.mxu1 %v1920_v33  ;;  %v1931_v33 = vld [vmem:[#allocation15 + $0x140] sm:$0xff] }
  0x64   :  { %639 = vmatpush.bf16.msrb.mxu0 %v1909_v26  ;;  %732 = vmatpush.bf16.msrb.mxu1 %v1919_v37  ;;  %v2017_v37 = vld [vmem:[#allocation17 + $0x4] ss:$0 sm:$0xff] }
  0x68   :  { %640 = vmatpush.bf16.msrb.mxu0 %v1908_v27  ;;  %733 = vmatpush.bf16.msrb.mxu1 %v1918_v41 }
  0x6c   :  { %641 = vmatpush.bf16.msrb.mxu0 %v1907_v28 }
  0xcb   :  { %v285_v39 = vpop.f32.mrf.mxu0 }
  0xcc   :  { %v352_v40 = vpop.f32.mrf.mxu1 }
  0xcd   :  { %v353_v43 = vadd.f32 %v352_v40, %v285_v39 }
  0xcf   :  { %v366_v48 = vadd.f32 %v2012_v44, %v353_v43 }
  0xd1   :  { %v370_v52 = vmax.f32 %v366_v48, 0.0 }
  0xd3   :  { %v287_v46 = vpop.f32.mrf.mxu0 }
  0xd4   :  { %v354_v47 = vpop.f32.mrf.mxu1 }
  0xd5   :  { %v355_v49 = vadd.f32 %v354_v47, %v287_v46 }
  0xd7   :  { %v367_v50 = vadd.f32 %v2012_v44, %v355_v49  ;;  %v1917_v49 = vld [vmem:[#allocation15 + $0xd0] sm:$0xff] }
  0xd8   :  { %734 = vmatpush.bf16.msrb.mxu1 %v1917_v49 }
  0xd9   :  { %v371_v53 = vmax.f32 %v367_v50, 0.0  ;;  %v1916_v50 = vld [vmem:[#allocation15 + $0xc8] sm:$0xff] }
  0xdb   :  { %v374_v54 = vpack.c.bf16 %v371_v53, %v370_v52  ;;  %v290_v55 = vpop.f32.mrf.mxu0  ;;  %v1930_v52 = vld [vmem:[#allocation15 + $0x138] sm:$0xff] }
  0xdc   :  { %v357_v56 = vpop.f32.mrf.mxu1  ;;  %735 = vmatpush.bf16.msrb.mxu1 %v1916_v50  ;;  %824 = vmatpush.bf16.msrb.mxu2 %v1930_v52 }
  0xdd   :  { %452 = vmatmul.bf16.vlgmr.msra.gmra.mxu2 %v374_v54  ;;  %v358_v57 = vadd.f32 %v357_v56, %v290_v55  ;;  %v1929_v54 = vld [vmem:[#allocation15 + $0x130] sm:$0xff]  ;;  %v2015_v55 = vld [vmem:[#allocation17 + $0x2] ss:$0 sm:$0xff]  ;;  %v1928_v56 = vld [vmem:[#allocation15 + $0x128] sm:$0xff] }
  0xdf   :  { %v368_v60 = vadd.f32 %v2012_v44, %v358_v57 }
  0xe0   :  { %736 = vmatpush.bf16.msrb.mxu1 %v1915_v51  ;;  %825 = vmatpush.bf16.msrb.mxu2 %v1929_v54  ;;  %v1941_v54 = vld [vmem:[#allocation15 + $0x190] sm:$0xff] }
  0xe1   :  { %v372_v63 = vmax.f32 %v368_v60, 0.0  ;;  %v1927_v60 = vld [vmem:[#allocation15 + $0x120] sm:$0xff] }
  0xe3   :  { %v292_v58 = vpop.f32.mrf.mxu0 }
  0xe4   :  { %v359_v59 = vpop.f32.mrf.mxu1  ;;  %826 = vmatpush.bf16.msrb.mxu2 %v1928_v56  ;;  %v1939_v56 = vld [vmem:[#allocation15 + $0x180] sm:$0xff] }
  0xe5   :  { %v360_v61 = vadd.f32 %v359_v59, %v292_v58 }
  0xe7   :  { %v369_v62 = vadd.f32 %v2012_v44, %v360_v61 }
  0xe8   :  { %827 = vmatpush.bf16.msrb.mxu2 %v1927_v60  ;;  %v2018_v60 = vld [vmem:[#allocation17 + $0x5] ss:$0 sm:$0xff] }
  0xe9   :  { %v373_v0 = vmax.f32 %v369_v62, 0.0 }
  0xeb   :  { %v375_v1 = vpack.c.bf16 %v373_v0, %v372_v63  ;;  %v1926_v0 = vld [vmem:[#allocation15 + $0x118] sm:$0xff] }
  0xec   :  { %828 = vmatpush.bf16.msrb.mxu2 %v1926_v0 }
  0xed   :  { %457 = vmatmul.bf16.gmra.mxu2 %v375_v1 }
  0xf0   :  { %829 = vmatpush.bf16.msrb.mxu2 %v1925_v8 }
 0x160   :  { %v453_v7 = vpop.f32.mrf.mxu2 }
 0x161   :  { %v454_v11 = vadd.f32 %v2013_v9, %v453_v7 }
 0x163   :  { %v463_v15 = vmax.f32 %v454_v11, 0.0  ;;  %v1938_v11 = vld [vmem:[#allocation15 + $0x178] sm:$0xff] }
 0x164   :  { %919 = vmatpush.bf16.msrb.mxu3 %v1938_v11 }
 0x168   :  { %v455_v12 = vpop.f32.mrf.mxu2 }
 0x169   :  { %v456_v13 = vadd.f32 %v2013_v9, %v455_v12 }
 0x16b   :  { %v464_v16 = vmax.f32 %v456_v13, 0.0  ;;  %v1937_v13 = vld [vmem:[#allocation15 + $0x170] sm:$0xff] }
 0x16c   :  { %920 = vmatpush.bf16.msrb.mxu3 %v1937_v13  ;;  %v1949_v13 = vld [vmem:[#allocation15 + $0x1d0] sm:$0xff] }
 0x16d   :  { %v467_v17 = vpack.c.bf16 %v464_v16, %v463_v15  ;;  %v1936_v15 = vld [vmem:[#allocation15 + $0x168] sm:$0xff] }
 0x16f   :  { %547 = vmatmul.bf16.vlgmr.msra.gmra.mxu3 %v467_v17 }
 0x170   :  { %v458_v19 = vpop.f32.mrf.mxu2  ;;  %921 = vmatpush.bf16.msrb.mxu3 %v1936_v15  ;;  %v1947_v15 = vld [vmem:[#allocation15 + $0x1c0] sm:$0xff] }
 0x171   :  { %v459_v20 = vadd.f32 %v2013_v9, %v458_v19  ;;  %v1935_v19 = vld [vmem:[#allocation15 + $0x160] sm:$0xff] }
 0x173   :  { %v465_v23 = vmax.f32 %v459_v20, 0.0 }
 0x174   :  { %922 = vmatpush.bf16.msrb.mxu3 %v1935_v19  ;;  %v2019_v19 = vld [vmem:[#allocation17 + $0x6] ss:$0 sm:$0xff] }
 0x178   :  { %v460_v21 = vpop.f32.mrf.mxu2 }
 0x179   :  { %v461_v22 = vadd.f32 %v2013_v9, %v460_v21  ;;  %v1924_v9 = vld [vmem:[#allocation15 + $0x108] sm:$0xff] }
 0x17a   :  { %830 = vmatpush.bf16.msrb.mxu2 %v1924_v9 }
 0x17b   :  { %v466_v24 = vmax.f32 %v461_v22, 0.0 }
 0x17d   :  { %v468_v25 = vpack.c.bf16 %v466_v24, %v465_v23  ;;  %v1934_v23 = vld [vmem:[#allocation15 + $0x158] sm:$0xff] }
 0x17e   :  { %831 = vmatpush.bf16.msrb.mxu2 %v1923_v10  ;;  %923 = vmatpush.bf16.msrb.mxu3 %v1934_v23 }
 0x17f   :  { %552 = vmatmul.bf16.gmra.mxu3 %v468_v25 }
 0x182   :  { %924 = vmatpush.bf16.msrb.mxu3 %v1933_v31 }
 0x1f2   :  { %v548_v30 = vpop.f32.mrf.mxu3 }
 0x1f3   :  { %v549_v34 = vadd.f32 %v2014_v32, %v548_v30 }
 0x1f5   :  { %v558_v38 = vmax.f32 %v549_v34, 0.0  ;;  %v1946_v34 = vld [vmem:[#allocation15 + $0x1b8] sm:$0xff] }
 0x1f6   :  { %1014 = vmatpush.bf16.msra.mxu0 %v1946_v34 }
 0x1fa   :  { %v550_v35 = vpop.f32.mrf.mxu3 }
 0x1fb   :  { %v551_v36 = vadd.f32 %v2014_v32, %v550_v35 }
 0x1fd   :  { %v559_v39 = vmax.f32 %v551_v36, 0.0  ;;  %v1945_v36 = vld [vmem:[#allocation15 + $0x1b0] sm:$0xff] }
 0x1fe   :  { %1015 = vmatpush.bf16.msra.mxu0 %v1945_v36  ;;  %v1957_v36 = vld [vmem:[#allocation15 + $0x210] sm:$0xff] }
 0x1ff   :  { %v562_v40 = vpack.c.bf16 %v559_v39, %v558_v38  ;;  %v1944_v38 = vld [vmem:[#allocation15 + $0x1a8] sm:$0xff] }
 0x201   :  { %642 = vmatmul.bf16.vlgmr.msrb.gmra.mxu0 %v562_v40 }
 0x202   :  { %v553_v42 = vpop.f32.mrf.mxu3  ;;  %1016 = vmatpush.bf16.msra.mxu0 %v1944_v38  ;;  %v1955_v38 = vld [vmem:[#allocation15 + $0x200] sm:$0xff] }
 0x203   :  { %v554_v43 = vadd.f32 %v2014_v32, %v553_v42  ;;  %v1943_v42 = vld [vmem:[#allocation15 + $0x1a0] sm:$0xff] }
 0x205   :  { %v560_v46 = vmax.f32 %v554_v43, 0.0 }
 0x206   :  { %1017 = vmatpush.bf16.msra.mxu0 %v1943_v42 }
 0x20a   :  { %v555_v44 = vpop.f32.mrf.mxu3 }
 0x20b   :  { %v556_v45 = vadd.f32 %v2014_v32, %v555_v44  ;;  %v1932_v32 = vld [vmem:[#allocation15 + $0x148] sm:$0xff] }
 0x20c   :  { %925 = vmatpush.bf16.msrb.mxu3 %v1932_v32 }
 0x20d   :  { %v561_v47 = vmax.f32 %v556_v45, 0.0 }
 0x20f   :  { %v563_v48 = vpack.c.bf16 %v561_v47, %v560_v46  ;;  %v1942_v46 = vld [vmem:[#allocation15 + $0x198] sm:$0xff] }
 0x210   :  { %926 = vmatpush.bf16.msrb.mxu3 %v1931_v33  ;;  %1018 = vmatpush.bf16.msra.mxu0 %v1942_v46 }
 0x211   :  { %647 = vmatmul.bf16.gmra.mxu0 %v563_v48 }
 0x214   :  { %1019 = vmatpush.bf16.msra.mxu0 %v1941_v54  ;;  %v2021_v54 = vld [vmem:[#allocation17 + $0x8] ss:$0 sm:$0xff] }
 0x27e   :  { %v643_v53 = vpop.f32.mrf.mxu0 }
 0x27f   :  { %v644_v57 = vadd.f32 %v2015_v55, %v643_v53 }
 0x281   :  { %v653_v61 = vmax.f32 %v644_v57, 0.0  ;;  %v1954_v57 = vld [vmem:[#allocation15 + $0x1f8] sm:$0xff] }
 0x282   :  { %1109 = vmatpush.bf16.msra.mxu1 %v1954_v57 }
 0x286   :  { %v645_v58 = vpop.f32.mrf.mxu0 }
 0x287   :  { %v646_v59 = vadd.f32 %v2015_v55, %v645_v58 }
 0x289   :  { %v654_v62 = vmax.f32 %v646_v59, 0.0  ;;  %v1953_v59 = vld [vmem:[#allocation15 + $0x1f0] sm:$0xff] }
 0x28a   :  { %1110 = vmatpush.bf16.msra.mxu1 %v1953_v59 }
 0x28b   :  { %v657_v63 = vpack.c.bf16 %v654_v62, %v653_v61  ;;  %v1952_v61 = vld [vmem:[#allocation15 + $0x1e8] sm:$0xff] }
 0x28d   :  { %737 = vmatmul.bf16.vlgmr.msrb.gmra.mxu1 %v657_v63 }
 0x28e   :  { %v648_v1 = vpop.f32.mrf.mxu0  ;;  %1111 = vmatpush.bf16.msra.mxu1 %v1952_v61 }
 0x28f   :  { %v649_v2 = vadd.f32 %v2015_v55, %v648_v1  ;;  %v1951_v1 = vld [vmem:[#allocation15 + $0x1e0] sm:$0xff] }
 0x291   :  { %v655_v5 = vmax.f32 %v649_v2, 0.0 }
 0x292   :  { %1112 = vmatpush.bf16.msra.mxu1 %v1951_v1 }
 0x296   :  { %v650_v3 = vpop.f32.mrf.mxu0 }
 0x297   :  { %v651_v4 = vadd.f32 %v2015_v55, %v650_v3  ;;  %v1940_v55 = vld [vmem:[#allocation15 + $0x188] sm:$0xff] }
 0x298   :  { %1020 = vmatpush.bf16.msra.mxu0 %v1940_v55 }
 0x299   :  { %v656_v6 = vmax.f32 %v651_v4, 0.0 }
 0x29b   :  { %v658_v7 = vpack.c.bf16 %v656_v6, %v655_v5  ;;  %v1950_v5 = vld [vmem:[#allocation15 + $0x1d8] sm:$0xff] }
 0x29c   :  { %1021 = vmatpush.bf16.msra.mxu0 %v1939_v56  ;;  %1113 = vmatpush.bf16.msra.mxu1 %v1950_v5 }
 0x29d   :  { %742 = vmatmul.bf16.gmra.mxu1 %v658_v7 }
 0x2a0   :  { %1114 = vmatpush.bf16.msra.mxu1 %v1949_v13 }
 0x30a   :  { %v738_v12 = vpop.f32.mrf.mxu1 }
 0x30b   :  { %v739_v16 = vadd.f32 %v2016_v14, %v738_v12 }
 0x30d   :  { %v748_v20 = vmax.f32 %v739_v16, 0.0  ;;  %v1962_v16 = vld [vmem:[#allocation15 + $0x238] sm:$0xff] }
 0x30e   :  { %1204 = vmatpush.bf16.msra.mxu2 %v1962_v16 }
 0x312   :  { %v740_v17 = vpop.f32.mrf.mxu1 }
 0x313   :  { %v741_v18 = vadd.f32 %v2016_v14, %v740_v17 }
 0x315   :  { %v749_v21 = vmax.f32 %v741_v18, 0.0  ;;  %v1961_v18 = vld [vmem:[#allocation15 + $0x230] sm:$0xff] }
 0x316   :  { %1205 = vmatpush.bf16.msra.mxu2 %v1961_v18 }
 0x317   :  { %v752_v22 = vpack.c.bf16 %v749_v21, %v748_v20  ;;  %v1960_v20 = vld [vmem:[#allocation15 + $0x228] sm:$0xff] }
 0x319   :  { %832 = vmatmul.bf16.vlgmr.msrb.gmra.mxu2 %v752_v22 }
 0x31a   :  { %v743_v24 = vpop.f32.mrf.mxu1  ;;  %1206 = vmatpush.bf16.msra.mxu2 %v1960_v20 }
 0x31b   :  { %v744_v25 = vadd.f32 %v2016_v14, %v743_v24  ;;  %v1959_v24 = vld [vmem:[#allocation15 + $0x220] sm:$0xff] }
 0x31d   :  { %v750_v28 = vmax.f32 %v744_v25, 0.0 }
 0x31e   :  { %1207 = vmatpush.bf16.msra.mxu2 %v1959_v24 }
 0x322   :  { %v745_v26 = vpop.f32.mrf.mxu1 }
 0x323   :  { %v746_v27 = vadd.f32 %v2016_v14, %v745_v26  ;;  %v1948_v14 = vld [vmem:[#allocation15 + $0x1c8] sm:$0xff] }
 0x324   :  { %1115 = vmatpush.bf16.msra.mxu1 %v1948_v14 }
 0x325   :  { %v751_v29 = vmax.f32 %v746_v27, 0.0 }
 0x327   :  { %v753_v30 = vpack.c.bf16 %v751_v29, %v750_v28  ;;  %v1958_v28 = vld [vmem:[#allocation15 + $0x218] sm:$0xff] }
 0x328   :  { %1116 = vmatpush.bf16.msra.mxu1 %v1947_v15  ;;  %1208 = vmatpush.bf16.msra.mxu2 %v1958_v28 }
 0x329   :  { %837 = vmatmul.bf16.gmra.mxu2 %v753_v30 }
 0x32c   :  { %1209 = vmatpush.bf16.msra.mxu2 %v1957_v36 }
 0x39c   :  { %v833_v35 = vpop.f32.mrf.mxu2 }
 0x39d   :  { %v834_v39 = vadd.f32 %v2017_v37, %v833_v35 }
 0x39f   :  { %v843_v43 = vmax.f32 %v834_v39, 0.0 }
 0x3a4   :  { %v835_v40 = vpop.f32.mrf.mxu2 }
 0x3a5   :  { %v836_v41 = vadd.f32 %v2017_v37, %v835_v40  ;;  %v2020_v40 = vld [vmem:[#allocation17 + $0x7] ss:$0 sm:$0xff] }
 0x3a7   :  { %v844_v44 = vmax.f32 %v836_v41, 0.0 }
 0x3a9   :  { %v847_v45 = vpack.c.bf16 %v844_v44, %v843_v43 }
 0x3ab   :  { %927 = vmatmul.bf16.vlgmr.msrb.gmra.mxu3 %v847_v45 }
 0x3ac   :  { %v838_v47 = vpop.f32.mrf.mxu2 }
 0x3ad   :  { %v839_v48 = vadd.f32 %v2017_v37, %v838_v47 }
 0x3af   :  { %v845_v51 = vmax.f32 %v839_v48, 0.0 }
 0x3b4   :  { %v840_v49 = vpop.f32.mrf.mxu2 }
 0x3b5   :  { %v841_v50 = vadd.f32 %v2017_v37, %v840_v49  ;;  %v1956_v37 = vld [vmem:[#allocation15 + $0x208] sm:$0xff] }
 0x3b6   :  { %1210 = vmatpush.bf16.msra.mxu2 %v1956_v37 }
 0x3b7   :  { %v846_v52 = vmax.f32 %v841_v50, 0.0 }
 0x3b9   :  { %v848_v53 = vpack.c.bf16 %v846_v52, %v845_v51 }
 0x3ba   :  { %1211 = vmatpush.bf16.msra.mxu2 %v1955_v38 }
 0x3bb   :  { %932 = vmatmul.bf16.gmra.mxu3 %v848_v53 }
 0x42e   :  { %v928_v58 = vpop.f32.mrf.mxu3 }
 0x42f   :  { %v929_v62 = vadd.f32 %v2018_v60, %v928_v58 }
 0x431   :  { %v938_v2 = vmax.f32 %v929_v62, 0.0 }
 0x436   :  { %v930_v63 = vpop.f32.mrf.mxu3 }
 0x437   :  { %v931_v0 = vadd.f32 %v2018_v60, %v930_v63 }
 0x439   :  { %v939_v3 = vmax.f32 %v931_v0, 0.0 }
 0x43b   :  { %v942_v4 = vpack.c.bf16 %v939_v3, %v938_v2 }
 0x43d   :  { %1022 = vmatmul.bf16.vlgmr.msra.gmra.mxu0 %v942_v4 }
 0x43e   :  { %v933_v6 = vpop.f32.mrf.mxu3 }
 0x43f   :  { %v934_v7 = vadd.f32 %v2018_v60, %v933_v6 }
 0x441   :  { %v940_v10 = vmax.f32 %v934_v7, 0.0 }
 0x446   :  { %v935_v8 = vpop.f32.mrf.mxu3 }
 0x447   :  { %v936_v9 = vadd.f32 %v2018_v60, %v935_v8 }
 0x449   :  { %v941_v11 = vmax.f32 %v936_v9, 0.0 }
 0x44b   :  { %v943_v12 = vpack.c.bf16 %v941_v11, %v940_v10 }
 0x44d   :  { %1027 = vmatmul.bf16.gmra.mxu0 %v943_v12 }
 0x4ba   :  { %v1023_v17 = vpop.f32.mrf.mxu0 }
 0x4bb   :  { %v1024_v21 = vadd.f32 %v2019_v19, %v1023_v17 }
 0x4bd   :  { %v1033_v25 = vmax.f32 %v1024_v21, 0.0 }
 0x4c2   :  { %v1025_v22 = vpop.f32.mrf.mxu0 }
 0x4c3   :  { %v1026_v23 = vadd.f32 %v2019_v19, %v1025_v22 }
 0x4c5   :  { %v1034_v26 = vmax.f32 %v1026_v23, 0.0 }
 0x4c7   :  { %v1037_v27 = vpack.c.bf16 %v1034_v26, %v1033_v25 }
 0x4c9   :  { %1117 = vmatmul.bf16.vlgmr.msra.gmra.mxu1 %v1037_v27 }
 0x4ca   :  { %v1028_v29 = vpop.f32.mrf.mxu0 }
 0x4cb   :  { %v1029_v30 = vadd.f32 %v2019_v19, %v1028_v29 }
 0x4cd   :  { %v1035_v33 = vmax.f32 %v1029_v30, 0.0 }
 0x4d2   :  { %v1030_v31 = vpop.f32.mrf.mxu0 }
 0x4d3   :  { %v1031_v32 = vadd.f32 %v2019_v19, %v1030_v31 }
 0x4d5   :  { %v1036_v34 = vmax.f32 %v1031_v32, 0.0 }
 0x4d7   :  { %v1038_v35 = vpack.c.bf16 %v1036_v34, %v1035_v33 }
 0x4d9   :  { %1122 = vmatmul.bf16.gmra.mxu1 %v1038_v35 }
 0x546   :  { %v1118_v39 = vpop.f32.mrf.mxu1 }
 0x547   :  { %v1119_v41 = vadd.f32 %v2020_v40, %v1118_v39 }
 0x549   :  { %v1128_v44 = vmax.f32 %v1119_v41, 0.0 }
 0x54e   :  { %v1120_v42 = vpop.f32.mrf.mxu1 }
 0x54f   :  { %v1121_v43 = vadd.f32 %v2020_v40, %v1120_v42 }
 0x551   :  { %v1129_v45 = vmax.f32 %v1121_v43, 0.0 }
 0x553   :  { %v1132_v46 = vpack.c.bf16 %v1129_v45, %v1128_v44 }
 0x555   :  { %1212 = vmatmul.bf16.vlgmr.msra.gmra.mxu2 %v1132_v46 }
 0x556   :  { %v1123_v47 = vpop.f32.mrf.mxu1 }
 0x557   :  { %v1124_v48 = vadd.f32 %v2020_v40, %v1123_v47 }
 0x559   :  { %v1130_v51 = vmax.f32 %v1124_v48, 0.0 }
 0x55e   :  { %v1125_v49 = vpop.f32.mrf.mxu1 }
 0x55f   :  { %v1126_v50 = vadd.f32 %v2020_v40, %v1125_v49 }
 0x561   :  { %v1131_v52 = vmax.f32 %v1126_v50, 0.0 }
 0x563   :  { %v1133_v53 = vpack.c.bf16 %v1131_v52, %v1130_v51 }
 0x565   :  { %1217 = vmatmul.bf16.gmra.mxu2 %v1133_v53 }
 0x5d8   :  { %v1213_v55 = vpop.f32.mrf.mxu2 }
 0x5d9   :  { %v1214_v56 = vadd.f32 %v2021_v54, %v1213_v55 }
 0x5db   :  { %1223 = vst [vmem:[#allocation4] sm:$0xff] %v1214_v56 }
 0x5e0   :  { %v1215_v57 = vpop.f32.mrf.mxu2 }
 0x5e1   :  { %v1216_v58 = vadd.f32 %v2021_v54, %v1215_v57 }
 0x5e3   :  { %1224 = vst [vmem:[#allocation4 + $0x8] sm:$0xff] %v1216_v58 }
 0x5e8   :  { %v1218_v59 = vpop.f32.mrf.mxu2 }
 0x5e9   :  { %v1219_v60 = vadd.f32 %v2021_v54, %v1218_v59 }
 0x5eb   :  { %1225 = vst [vmem:[#allocation4 + $0x10] sm:$0xff] %v1219_v60 }
 0x5f0   :  { %v1220_v61 = vpop.f32.mrf.mxu2 }
 0x5f1   :  { %v1221_v62 = vadd.f32 %v2021_v54, %v1220_v61 }
 0x5f3   :  { %1226 = vst [vmem:[#allocation4 + $0x18] sm:$0xff] %v1221_v62 }
 0x5f4 LB: > { %s1234_s0 = sld [smem:[#allocation7 + %s2266_s5]]  ;;  %p1235_p1 = scmp.lt.s32.totalorder %s2266_s5, 32  ;;  %s2266_s5 = sphi %s2264_s5, %s1232_s5  }
 0x5f5   : > { %s1238_s13 = scalar_lea.vmem [#allocation4], %s2266_s5  ;;  %s1232_s5 = sadd.s32 1, %s2266_s5  }
 0x5f6   : > { %s1236_s2 = scalar_select %p1235_p1, 1, 0 }
 0x5f7   : > { %p1229_p2 = scmp.ge.s32.totalorder %s1232_s5, 32  }
 0x5f8   : > { %s1237_s1 = scvt.s32.f32 %s1236_s2  ;;  %v1970_v4 = vld [vmem:[#allocation18 + $0x38] sm:$0xff] (%p1229_p2)  ;;  %v1969_v5 = vld [vmem:[#allocation18 + $0x30] sm:$0xff] (%p1229_p2)  ;;  %v1968_v8 = vld [vmem:[#allocation18 + $0x28] sm:$0xff] (%p1229_p2)  ;;  %s2284_s21 = smov (%p1229_p2), [#allocation21]  }
 0x5f9   :  { %1320 = vmatpush.bf16.msra.mxu3 (%p1229_p2), %v1970_v4  ;;  %v1978_v6 = vld [vmem:[#allocation20 + $0x38] sm:$0xff] (%p1229_p2)  ;;  %v1977_v7 = vld [vmem:[#allocation20 + $0x30] sm:$0xff] (%p1229_p2)  ;;  %v1976_v9 = vld [vmem:[#allocation20 + $0x28] sm:$0xff] (%p1229_p2)  ;;  %s1425_s3 = sshll.u32 (%p1229_p2), %s2284_s21, 4  ;;  %s1426_s3 = int_to_ptr.vmem [resolvable:$true] %s1425_s3 }
 0x5fa   : > { %v1239_v63 = vld [vmem:[%s1238_s13] sm:$0x1]  ;;  %v1240_v0 = vstv %s1237_s1  ;;  %s1242_s14 = scalar_lea.vmem [#allocation5], %s1234_s0  ;;  %1405 = vmatpush.bf16.msrb.mxu0 (%p1229_p2), %v1978_v6  ;;  %v1967_v10 = vld [vmem:[#allocation18 + $0x20] sm:$0xff] (%p1229_p2)  ;;  %v1966_v12 = vld [vmem:[#allocation18 + $0x18] sm:$0xff] (%p1229_p2) }
 0x5fb   : > { %v1241_v1 = vmul.f32 %v1240_v0, %v1239_v63  ;;  %v1243_v2 = vld [vmem:[%s1242_s14] sm:$0x1]  ;;  %1231 = sbr.rel (!%p1229_p2) target bundleno = 1524 (0x5f4), region = 143  ;;  %v1975_v11 = vld [vmem:[#allocation20 + $0x20] sm:$0xff] (%p1229_p2)  ;;  %v1964_v14 = vld [vmem:[#allocation18 + $0x8] sm:$0xff] (%p1229_p2) }
 0x5fc   :  { %v1965_v13 = vld [vmem:[#allocation18 + $0x10] sm:$0xff] (%p1229_p2)  ;;  %v1963_v15 = vld [vmem:[#allocation18] sm:$0xff] (%p1229_p2)  ;;  %v1974_v19 = vld [vmem:[#allocation20 + $0x18] sm:$0xff] (%p1229_p2) }
 0x5fd   : > { %v1244_v3 = vadd.f32 %v1243_v2, %v1241_v1  ;;  %1321 = vmatpush.bf16.msra.mxu3 (%p1229_p2), %v1969_v5  ;;  %v1973_v20 = vld [vmem:[#allocation20 + $0x10] sm:$0xff] (%p1229_p2)  ;;  %v1972_v21 = vld [vmem:[#allocation20 + $0x8] sm:$0xff] (%p1229_p2)  ;;  %v1971_v22 = vld [vmem:[#allocation20] sm:$0xff] (%p1229_p2) }
 0x5fe   :  { %1406 = vmatpush.bf16.msrb.mxu0 (%p1229_p2), %v1977_v7  ;;  %v2022_v24 = vld [vmem:[%s2418_s9] ss:$0 sm:$0xff] (%p1229_p2)  ;;  %s1427_s9 = sshll.u32 (%p1229_p2), %s2421_s12, 4  ;;  %s1428_s9 = int_to_ptr.hbm [resolvable:$true] %s1427_s9 }
 0x5ff   : > { %1245 = vst [vmem:[%s1242_s14] sm:$0x1] %v1244_v3  ;;  %v2023_v31 = vld [vmem:[%s2420_s11] ss:$0 sm:$0xff] (%p1229_p2) }
 0x601   :  { %1322 = vmatpush.bf16.msra.mxu3 %v1968_v8 }
 0x602   :  { %1407 = vmatpush.bf16.msrb.mxu0 %v1976_v9 }
 0x605   :  { %1323 = vmatpush.bf16.msra.mxu3 %v1967_v10 }
 0x606   :  { %1408 = vmatpush.bf16.msrb.mxu0 %v1975_v11  ;;  %v1249_v16 = vld [vmem:[#allocation5] sm:$0xff]  ;;  %v1250_v17 = vld [vmem:[#allocation5 + $0x8] sm:$0xff] }
 0x607   :  { %v1251_v18 = vpack.c.bf16 %v1250_v17, %v1249_v16 }
 0x609   :  { %1324 = vmatpush.bf16.msra.mxu3 %v1966_v12 }
 0x60a   :  { %1409 = vmatpush.bf16.msrb.mxu0 %v1974_v19 }
 0x60d   :  { %1325 = vmatpush.bf16.msra.mxu3 %v1965_v13 }
 0x60e   :  { %1410 = vmatpush.bf16.msrb.mxu0 %v1973_v20 }
 0x611   :  { %1326 = vmatpush.bf16.msra.mxu3 %v1964_v14 }
 0x612   :  { %1411 = vmatpush.bf16.msrb.mxu0 %v1972_v21 }
 0x615   :  { %1327 = vmatpush.bf16.msra.mxu3 %v1963_v15 }
 0x616   :  { %1412 = vmatpush.bf16.msrb.mxu0 %v1971_v22 }
 0x618   :  { %1328 = vmatmul.bf16.vlgmr.msra.gmra.mxu3 %v1251_v18 }
 0x69b   :  { %v1329_v23 = vpop.f32.mrf.mxu3 }
 0x69c   :  { %v1330_v25 = vadd.f32 %v2022_v24, %v1329_v23 }
 0x69e   :  { %v1334_v28 = vmax.f32 %v1330_v25, 0.0 }
 0x6a3   :  { %v1331_v26 = vpop.f32.mrf.mxu3 }
 0x6a4   :  { %v1332_v27 = vadd.f32 %v2022_v24, %v1331_v26 }
 0x6a6   :  { %v1335_v29 = vmax.f32 %v1332_v27, 0.0 }
 0x6a8   :  { %v1336_v30 = vpack.c.bf16 %v1335_v29, %v1334_v28 }
 0x6aa   :  { %1413 = vmatmul.bf16.vlgmr.msrb.gmra.mxu0 %v1336_v30 }
 0x727   :  { %v1414_v32 = vpop.f32.mrf.mxu0 }
 0x728   :  { %v1415_v33 = vadd.f32 %v2023_v31, %v1414_v32 }
 0x72a   :  { %1419 = vst [vmem:[#allocation21] sm:$0xff] %v1415_v33 }
 0x72f   :  { %v1416_v34 = vpop.f32.mrf.mxu0 }
 0x730   :  { %v1417_v35 = vadd.f32 %v2023_v31, %v1416_v34 }
 0x732   :  { %1420 = vst [vmem:[#allocation21 + $0x8] sm:$0xff] %v1417_v35 }
 0x733   :  { %1433 = dma.vmem_to_hbm [thread:$0]  %s1426_s3, 256, %s1428_s9, [#allocation11], %s2276_s28, %s2276_s28, %s2277_s29  }
 0x734   :  { %2258 = dma.done.wait [#allocation11], 256  }
 0x735   :  { %2259 = vsyncadd [#allocation11], 4294967040 }
 0x736   :  { %1438 = vsyncpa [#allocation10], 1 }
 0x737   :  { %1439 = vsyncpa [#allocation13], 1 }
 0x738   :  { %1440 = vsyncpa [#allocation16], 1 }
 0x739   :  { %1441 = vsyncpa [#allocation19], 1 }
 0x73a   :  { %1442 = vsyncpa [#allocation11], 1 }

</bundles_post_ra>
